<compile_context>
chip_gen: v6e
topology: v6e:2x2x1
jax: 0.10.0
libtpu: 0.0.40
codegen_flags: <defaults>
</compile_context>

<pallas_src>
import functools
import math

import jax
import jax.numpy as jnp
from jax.experimental import pallas as pl
from jax.experimental.pallas import tpu as pltpu

LN_EPS = 1e-5          # torch.nn.LayerNorm default
NEG_INF = -1e30        # finite additive mask; exp() underflows to exactly 0
INV_SQRT2 = 1.0 / math.sqrt(2.0)


# ----------------------------- in-kernel helpers -----------------------------

def _layernorm(h, g, b):
    """f32 LayerNorm matching torch (biased variance)."""
    mu = jnp.mean(h, axis=-1, keepdims=True)
    var = jnp.mean((h - mu) ** 2, axis=-1, keepdims=True)
    return (h - mu) * jax.lax.rsqrt(var + LN_EPS) * g + b


def _mm(x_f32, w_bf16):
    """bf16 MXU matmul with f32 accumulation."""
    return jnp.dot(x_f32.astype(jnp.bfloat16), w_bf16,
                   preferred_element_type=jnp.float32)


# Exact (erf-based) GELU.  erf is built from exp + polynomial
# (Abramowitz & Stegun 7.1.26, |abs err| < 1.5e-7 ~= f32 noise) because
# lax.erf lowering in Mosaic is not guaranteed across JAX versions; this keeps
# nn.GELU()'s exact-GELU semantics to within f32 precision.
_ERF_A = (0.254829592, -0.284496736, 1.421413741, -1.453152027, 1.061405429)
_ERF_P = 0.3275911


def _erf(z):
    a = jnp.abs(z)
    t = 1.0 / (1.0 + _ERF_P * a)
    a1, a2, a3, a4, a5 = _ERF_A
    poly = ((((a5 * t + a4) * t + a3) * t + a2) * t + a1) * t
    pos = 1.0 - poly * jnp.exp(-a * a)
    return jnp.where(z >= 0, pos, -pos)


def _gelu_exact(x):
    return 0.5 * x * (1.0 + _erf(x * INV_SQRT2))


def _attention(q, k, v, num_heads, wo_ref, bias):
    """Multi-head attention for one batch element.
    q: (Tq, D) f32, k/v: (Tk, D) f32 (1/sqrt(hd) already folded into q).
    wo_ref: (1, H, hd, D) bf16 output-projection ref (leading-axis indexed).
    bias:  None or additive (Tq, Tk) f32 causal mask.
    Returns concat_h(softmax(q_h k_h^T + bias) v_h) @ W_o  as (Tq, D) f32."""
    Tq, D = q.shape
    hd = D // num_heads
    # casts hoisted out of the head loop (done once per attention call)
    qb = q.astype(jnp.bfloat16)
    kb = k.astype(jnp.bfloat16)
    vb = v.astype(jnp.bfloat16)

    acc = jnp.zeros((Tq, D), jnp.float32)
    for hh in range(num_heads):          # static unroll, H=4
        lo = hh * hd
        # scores: contract head dims directly (no materialized transpose)
        s = jax.lax.dot_general(qb[:, lo:lo + hd], kb[:, lo:lo + hd],
                                (((1,), (1,)), ((), ())),
                                preferred_element_type=jnp.float32)
        if bias is not None:
            s = s + bias
        # f32 softmax; reciprocal on the EUP slot instead of a VALU divide
        m = jnp.max(s, axis=-1, keepdims=True)
        e = jnp.exp(s - m)
        p = e * pl.reciprocal(jnp.sum(e, axis=-1, keepdims=True), approx=True)
        o = jnp.dot(p.astype(jnp.bfloat16), vb[:, lo:lo + hd],
                    preferred_element_type=jnp.float32)          # (Tq, hd)
        # fold output projection: concat_h(o_h) @ Wo == sum_h o_h @ Wo[h]
        acc = acc + jnp.dot(o.astype(jnp.bfloat16), wo_ref[0, hh],
                            preferred_element_type=jnp.float32)  # (Tq, D)
    return acc


# ----------------------------- fused decoder kernel --------------------------

def decoder_kernel(num_heads,
                   x_ref, enc_ref,
                   ln1g, ln1b, sqkvw, sqkvb, sow, sob,
                   ln2g, ln2b, cqw, cqb, ckvw, ckvb, cow, cob,
                   ln3g, ln3b, w1, b1, w2, b2,
                   outw, outb,
                   o_ref,
                   x_vmem):
    """Grid = (B, L).  Axis 0 (batch) is 'parallel', axis 1 (layer) is
    'arbitrary'; the activation for the current batch element is carried in
    the persistent VMEM scratch x_vmem across layer iterations."""
    l = pl.program_id(1)
    n_layers = pl.num_programs(1)
    T, D = x_ref.shape[1], x_ref.shape[2]

    # First layer of this batch element: load the embedded input.
    @pl.when(l == 0)
    def _():
        x_vmem[...] = x_ref[0]

    x = x_vmem[...]            # (T, D)  f32
    enc = enc_ref[0]           # (Tc, D) f32  (resident across layers)

    # causal additive bias (2-D, built once per grid step; tiny)
    row = jax.lax.broadcasted_iota(jnp.int32, (T, T), 0)
    col = jax.lax.broadcasted_iota(jnp.int32, (T, T), 1)
    causal_bias = jnp.where(row >= col, 0.0, NEG_INF).astype(jnp.float32)

    # ---- x = x + self_attn(norm1(x), causal)  (scale pre-folded into Q) ----
    h = _layernorm(x, ln1g[0], ln1b[0])
    qkv = _mm(h, sqkvw[0]) + sqkvb[0]                      # fused QKV (T, 3D)
    att = _attention(qkv[:, :D], qkv[:, D:2 * D], qkv[:, 2 * D:],
                     num_heads, sow, causal_bias)
    x = x + att + sob[0]

    # ---- x = x + cross_attn(norm2(x), enc_out) ----
    h = _layernorm(x, ln2g[0], ln2b[0])
    q = _mm(h, cqw[0]) + cqb[0]                            # (T, D)
    kv = _mm(enc, ckvw[0]) + ckvb[0]                       # fused KV (Tc, 2D)
    att = _attention(q, kv[:, :D], kv[:, D:], num_heads, cow, None)
    x = x + att + cob[0]

    # ---- x = x + mlp(norm3(x))  (Linear, exact GELU, Linear) ----
    h = _layernorm(x, ln3g[0], ln3b[0])
    m = _gelu_exact(_mm(h, w1[0]) + b1[0])
    x = x + _mm(m, w2[0]) + b2[0]

    x_vmem[...] = x

    # ---- last layer: lane-dense (padded) vocab projection ----
    @pl.when(l == n_layers - 1)
    def _():
        o_ref[0] = (_mm(x, outw[...]) + outb[...]).astype(o_ref.dtype)


# ----------------------------- parameter construction ------------------------

def init_linear(key, fan_in, fan_out):
    """nn.Linear default init: U(-1/sqrt(fan_in), 1/sqrt(fan_in)); W stored (in, out)."""
    kw, kb = jax.random.split(key)
    bound = 1.0 / math.sqrt(fan_in)
    w = jax.random.uniform(kw, (fan_in, fan_out), jnp.float32, -bound, bound)
    b = jax.random.uniform(kb, (1, fan_out), jnp.float32, -bound, bound)
    return w, b


PARAM_NAMES = ["ln1g", "ln1b", "sqkvw", "sqkvb", "sow", "sob",
               "ln2g", "ln2b", "cqw", "cqb", "ckvw", "ckvb", "cow", "cob",
               "ln3g", "ln3b", "w1", "b1", "w2", "b2"]
BF16_WEIGHTS = {"sqkvw", "sow", "cqw", "ckvw", "cow", "w1", "w2"}


def init_layer_params(key, D, M, num_heads):
    hd = D // num_heads
    scale = 1.0 / math.sqrt(hd)       # folded into Q weights/bias (one-time)
    ks = jax.random.split(key, 10)
    sqw, sqb = init_linear(ks[0], D, D)
    skw, skb = init_linear(ks[1], D, D)
    svw, svb = init_linear(ks[2], D, D)
    sow, sob = init_linear(ks[3], D, D)
    cqw, cqb = init_linear(ks[4], D, D)
    ckw, ckb = init_linear(ks[5], D, D)
    cvw, cvb = init_linear(ks[6], D, D)
    cow, cob = init_linear(ks[7], D, D)
    w1, b1 = init_linear(ks[8], D, M)
    w2, b2 = init_linear(ks[9], M, D)
    ones = jnp.ones((1, D), jnp.float32)
    zeros = jnp.zeros((1, D), jnp.float32)
    return dict(
        ln1g=ones, ln1b=zeros,
        sqkvw=jnp.concatenate([sqw * scale, skw, svw], axis=1),   # (D, 3D)
        sqkvb=jnp.concatenate([sqb * scale, skb, svb], axis=1),   # (1, 3D)
        sow=sow.reshape(num_heads, hd, D), sob=sob,               # (H, hd, D)
        ln2g=ones, ln2b=zeros,
        cqw=cqw * scale, cqb=cqb * scale,
        ckvw=jnp.concatenate([ckw, cvw], axis=1),                 # (D, 2D)
        ckvb=jnp.concatenate([ckb, cvb], axis=1),                 # (1, 2D)
        cow=cow.reshape(num_heads, hd, D), cob=cob,               # (H, hd, D)
        ln3g=ones, ln3b=zeros,
        w1=w1, b1=b1, w2=w2, b2=b2,
    )


def stack_layer_params(layer_dicts):
    """Stack per-layer params to (L, ...); weight matrices cast to bf16 once."""
    stacked = []
    for name in PARAM_NAMES:
        arr = jnp.stack([d[name] for d in layer_dicts], axis=0)
        if name in BF16_WEIGHTS:
            arr = arr.astype(jnp.bfloat16)
        stacked.append(arr)
    return stacked


def prepare_output_proj(out_w, out_b):
    """Pad the vocab projection to a 128-lane-dense width once, at prep time."""
    D, V = out_w.shape
    Vpad = ((V + 127) // 128) * 128
    out_w_p = jnp.zeros((D, Vpad), jnp.float32).at[:, :V].set(out_w)
    out_w_p = out_w_p.astype(jnp.bfloat16)
    out_b_p = jnp.zeros((1, Vpad), jnp.float32).at[:, :V].set(out_b)
    return out_w_p, out_b_p


# ------------------------------------ wrapper --------------------------------

@functools.partial(jax.jit, static_argnames=("num_heads",))
def transformer_decoder_forward(target, enc_out, embed_w, pos_embed,
                                stacked_params, out_w_p, out_b_p, *, num_heads):
    B, T = target.shape
    Tc = enc_out.shape[1]
    D = embed_w.shape[1]
    V = embed_w.shape[0]               # vocab size (== output projection width)
    Vpad = out_w_p.shape[1]
    L = stacked_params[0].shape[0]

    # Glue (not the hot path): embedding gather + positional embedding.
    x = (jnp.take(embed_w, target, axis=0) + pos_embed[:, :T]).astype(jnp.float32)
    enc = enc_out.astype(jnp.float32)

    def _layer_spec(arr):
        """One layer's block of a stacked (L, ...) parameter."""
        zeros = (0,) * (arr.ndim - 1)
        return pl.BlockSpec((1,) + arr.shape[1:],
                            lambda b, l, _z=zeros: (l,) + _z)

    in_specs = (
        [pl.BlockSpec((1, T, D), lambda b, l: (b, 0, 0)),      # x (per batch)
         pl.BlockSpec((1, Tc, D), lambda b, l: (b, 0, 0))]     # enc (per batch)
        + [_layer_spec(p) for p in stacked_params]             # per-layer blocks
        + [pl.BlockSpec((D, Vpad), lambda b, l: (0, 0)),       # vocab W (resident)
           pl.BlockSpec((1, Vpad), lambda b, l: (0, 0))]       # vocab b (resident)
    )

    kernel = functools.partial(decoder_kernel, num_heads)
    logits_pad = pl.pallas_call(
        kernel,
        out_shape=jax.ShapeDtypeStruct((B, T, Vpad), jnp.float32),
        grid_spec=pltpu.PrefetchScalarGridSpec(
            num_scalar_prefetch=0,
            grid=(B, L),                                       # batch, layers
            in_specs=in_specs,
            out_specs=pl.BlockSpec((1, T, Vpad), lambda b, l: (b, 0, 0)),
            scratch_shapes=[pltpu.VMEM((T, D), jnp.float32)],  # carried activation
        ),
        compiler_params=pltpu.CompilerParams(
            dimension_semantics=("parallel", "arbitrary"),
            # modest limit: footprint here is tiny; 32 MiB fits v5e/v6e/v7x
            # with headroom (v7x physical is only 64 MiB per core).
            vmem_limit_bytes=32 * 1024 * 1024,
        ),
    )(x, enc, *stacked_params, out_w_p, out_b_p)

    return logits_pad[..., :V]


# ------------------------------------ main ------------------------------------

if __name__ == "__main__":
    # Small, module-consistent shapes.
    B, T, Tc = 2, 8, 16
    vocab_size, max_len = 13, 8
    embed_dim, num_heads, mlp_dim, num_layers = 32, 4, 64, 2

    root = jax.random.PRNGKey(0)
    k_tgt, k_enc, k_emb, k_pos, k_layers, k_out = jax.random.split(root, 6)

    target = jax.random.randint(k_tgt, (B, T), 0, vocab_size, dtype=jnp.int32)
    enc_out = jax.random.normal(k_enc, (B, Tc, embed_dim), jnp.float32)

    # nn.Embedding default init: N(0, 1)
    embed_w = jax.random.normal(k_emb, (vocab_size, embed_dim), jnp.float32)
    # trunc_normal_(std=0.02)
    pos_embed = 0.02 * jax.random.truncated_normal(
        k_pos, -2.0, 2.0, (1, max_len, embed_dim), jnp.float32)

    layer_dicts = [init_layer_params(k, embed_dim, mlp_dim, num_heads)
                   for k in jax.random.split(k_layers, num_layers)]
    stacked_params = stack_layer_params(layer_dicts)
    out_w, out_b = init_linear(k_out, embed_dim, vocab_size)
    out_w_p, out_b_p = prepare_output_proj(out_w, out_b)

    logits = transformer_decoder_forward(
        target, enc_out, embed_w, pos_embed, stacked_params, out_w_p, out_b_p,
        num_heads=num_heads)
    jax.block_until_ready(logits)
    assert logits.shape == (B, T, vocab_size)
    assert bool(jnp.all(jnp.isfinite(logits)))
    print("KERNEL_OK")
</pallas_src>

<mosaic_0001>
module attributes {stable_mosaic.version = 11 : i64} {
  func.func @decoder_kernel(%arg0: i32, %arg1: i32, %arg2: memref<1x8x32xf32, #tpu.memory_space<vmem>>, %arg3: memref<1x16x32xf32, #tpu.memory_space<vmem>>, %arg4: memref<1x1x32xf32, #tpu.memory_space<vmem>>, %arg5: memref<1x1x32xf32, #tpu.memory_space<vmem>>, %arg6: memref<1x32x96xbf16, #tpu.memory_space<vmem>>, %arg7: memref<1x1x96xf32, #tpu.memory_space<vmem>>, %arg8: memref<1x4x8x32xbf16, #tpu.memory_space<vmem>>, %arg9: memref<1x1x32xf32, #tpu.memory_space<vmem>>, %arg10: memref<1x1x32xf32, #tpu.memory_space<vmem>>, %arg11: memref<1x1x32xf32, #tpu.memory_space<vmem>>, %arg12: memref<1x32x32xbf16, #tpu.memory_space<vmem>>, %arg13: memref<1x1x32xf32, #tpu.memory_space<vmem>>, %arg14: memref<1x32x64xbf16, #tpu.memory_space<vmem>>, %arg15: memref<1x1x64xf32, #tpu.memory_space<vmem>>, %arg16: memref<1x4x8x32xbf16, #tpu.memory_space<vmem>>, %arg17: memref<1x1x32xf32, #tpu.memory_space<vmem>>, %arg18: memref<1x1x32xf32, #tpu.memory_space<vmem>>, %arg19: memref<1x1x32xf32, #tpu.memory_space<vmem>>, %arg20: memref<1x32x64xbf16, #tpu.memory_space<vmem>>, %arg21: memref<1x1x64xf32, #tpu.memory_space<vmem>>, %arg22: memref<1x64x32xbf16, #tpu.memory_space<vmem>>, %arg23: memref<1x1x32xf32, #tpu.memory_space<vmem>>, %arg24: memref<32x128xbf16, #tpu.memory_space<vmem>>, %arg25: memref<1x128xf32, #tpu.memory_space<vmem>>, %arg26: memref<1x8x128xf32, #tpu.memory_space<vmem>>, %arg27: memref<8x32xf32, #tpu.memory_space<vmem>>) attributes {dimension_semantics = [#tpu.dimension_semantics<parallel>, #tpu.dimension_semantics<arbitrary>], iteration_bounds = array<i64: 2, 2>, scalar_prefetch = 0 : i64, scratch_operands = 1 : i64, tpu.core_type = #tpu.core_type<tc>, window_params = [{transform_indices = @transform_0, window_bounds = array<i64: 1, 8, 32>}, {transform_indices = @transform_1, window_bounds = array<i64: 1, 16, 32>}, {transform_indices = @transform_2, window_bounds = array<i64: 1, 1, 32>}, {transform_indices = @transform_3, window_bounds = array<i64: 1, 1, 32>}, {transform_indices = @transform_4, window_bounds = array<i64: 1, 32, 96>}, {transform_indices = @transform_5, window_bounds = array<i64: 1, 1, 96>}, {transform_indices = @transform_6, window_bounds = array<i64: 1, 4, 8, 32>}, {transform_indices = @transform_7, window_bounds = array<i64: 1, 1, 32>}, {transform_indices = @transform_8, window_bounds = array<i64: 1, 1, 32>}, {transform_indices = @transform_9, window_bounds = array<i64: 1, 1, 32>}, {transform_indices = @transform_10, window_bounds = array<i64: 1, 32, 32>}, {transform_indices = @transform_11, window_bounds = array<i64: 1, 1, 32>}, {transform_indices = @transform_12, window_bounds = array<i64: 1, 32, 64>}, {transform_indices = @transform_13, window_bounds = array<i64: 1, 1, 64>}, {transform_indices = @transform_14, window_bounds = array<i64: 1, 4, 8, 32>}, {transform_indices = @transform_15, window_bounds = array<i64: 1, 1, 32>}, {transform_indices = @transform_16, window_bounds = array<i64: 1, 1, 32>}, {transform_indices = @transform_17, window_bounds = array<i64: 1, 1, 32>}, {transform_indices = @transform_18, window_bounds = array<i64: 1, 32, 64>}, {transform_indices = @transform_19, window_bounds = array<i64: 1, 1, 64>}, {transform_indices = @transform_20, window_bounds = array<i64: 1, 64, 32>}, {transform_indices = @transform_21, window_bounds = array<i64: 1, 1, 32>}, {pipeline_mode = #tpu.pipeline_mode<synchronous>, transform_indices = @transform_22, window_bounds = array<i64: 32, 128>}, {pipeline_mode = #tpu.pipeline_mode<synchronous>, transform_indices = @transform_23, window_bounds = array<i64: 1, 128>}, {transform_indices = @transform_24, window_bounds = array<i64: 1, 8, 128>}]} {
    %c0_i32 = arith.constant 0 : i32
    %0 = arith.cmpi eq, %arg1, %c0_i32 : i32
    %1 = arith.extui %0 : i1 to i32
    %c0_i32_0 = arith.constant 0 : i32
    %2 = arith.cmpi ne, %1, %c0_i32_0 : i32
    scf.if %2 {
      %c0_169 = arith.constant 0 : index
      %c0_170 = arith.constant 0 : index
      %c0_171 = arith.constant 0 : index
      %370 = vector.load %arg2[%c0_169, %c0_170, %c0_171] : memref<1x8x32xf32, #tpu.memory_space<vmem>>, vector<1x8x32xf32>
      %371 = vector.shape_cast %370 : vector<1x8x32xf32> to vector<8x32xf32>
      %c0_172 = arith.constant 0 : index
      %c0_173 = arith.constant 0 : index
      %372 = vector.load %arg27[%c0_172, %c0_173] : memref<8x32xf32, #tpu.memory_space<vmem>>, vector<8x32xf32>
      tpu.vector_store %arg27[%c0_172, %c0_173], %371 {strides = array<i32>} : memref<8x32xf32, #tpu.memory_space<vmem>>, vector<8x32xf32>,
    } else {
    }
    %c0 = arith.constant 0 : index
    %c0_1 = arith.constant 0 : index
    %3 = vector.load %arg27[%c0, %c0_1] : memref<8x32xf32, #tpu.memory_space<vmem>>, vector<8x32xf32>
    %c0_2 = arith.constant 0 : index
    %c0_3 = arith.constant 0 : index
    %c0_4 = arith.constant 0 : index
    %4 = vector.load %arg3[%c0_2, %c0_3, %c0_4] : memref<1x16x32xf32, #tpu.memory_space<vmem>>, vector<1x16x32xf32>
    %5 = vector.shape_cast %4 : vector<1x16x32xf32> to vector<16x32xf32>
    %6 = tpu.iota {dimensions = array<i32: 0>} : vector<8x8xi32>
    %7 = tpu.iota {dimensions = array<i32: 1>} : vector<8x8xi32>
    %8 = arith.cmpi sge, %6, %7 : vector<8x8xi32>
    %cst = arith.constant 0.000000e+00 : f32
    %cst_5 = arith.constant -1.000000e+30 : f32
    %9 = vector.broadcast %cst : f32 to vector<8x8xf32>
    %10 = vector.broadcast %cst_5 : f32 to vector<8x8xf32>
    %11 = arith.select %8, %9, %10 : vector<8x8xi1>, vector<8x8xf32>
    %c0_6 = arith.constant 0 : index
    %c0_7 = arith.constant 0 : index
    %c0_8 = arith.constant 0 : index
    %12 = vector.load %arg4[%c0_6, %c0_7, %c0_8] : memref<1x1x32xf32, #tpu.memory_space<vmem>>, vector<1x1x32xf32>
    %13 = vector.shape_cast %12 : vector<1x1x32xf32> to vector<1x32xf32>
    %c0_9 = arith.constant 0 : index
    %c0_10 = arith.constant 0 : index
    %c0_11 = arith.constant 0 : index
    %14 = vector.load %arg5[%c0_9, %c0_10, %c0_11] : memref<1x1x32xf32, #tpu.memory_space<vmem>>, vector<1x1x32xf32>
    %15 = vector.shape_cast %14 : vector<1x1x32xf32> to vector<1x32xf32>
    %cst_12 = arith.constant dense<0.000000e+00> : vector<8xf32>
    %16 = vector.multi_reduction <add>, %3, %cst_12 [1] : vector<8x32xf32> to vector<8xf32>
    %17 = vector.shape_cast %16 : vector<8xf32> to vector<8x1xf32>
    %cst_13 = arith.constant 3.200000e+01 : f32
    %18 = vector.broadcast %cst_13 : f32 to vector<8x1xf32>
    %19 = arith.divf %17, %18 : vector<8x1xf32>
    %20 = vector.broadcast %19 : vector<8x1xf32> to vector<8x32xf32>
    %21 = arith.subf %3, %20 : vector<8x32xf32>
    %22 = arith.mulf %21, %21 : vector<8x32xf32>
    %cst_14 = arith.constant dense<0.000000e+00> : vector<8xf32>
    %23 = vector.multi_reduction <add>, %22, %cst_14 [1] : vector<8x32xf32> to vector<8xf32>
    %24 = vector.shape_cast %23 : vector<8xf32> to vector<8x1xf32>
    %cst_15 = arith.constant 3.200000e+01 : f32
    %25 = vector.broadcast %cst_15 : f32 to vector<8x1xf32>
    %26 = arith.divf %24, %25 : vector<8x1xf32>
    %27 = vector.broadcast %19 : vector<8x1xf32> to vector<8x32xf32>
    %28 = arith.subf %3, %27 : vector<8x32xf32>
    %cst_16 = arith.constant 9.99999974E-6 : f32
    %29 = vector.broadcast %cst_16 : f32 to vector<8x1xf32>
    %30 = arith.addf %26, %29 : vector<8x1xf32>
    %31 = math.rsqrt %30 : vector<8x1xf32>
    %32 = vector.broadcast %31 : vector<8x1xf32> to vector<8x32xf32>
    %33 = arith.mulf %28, %32 : vector<8x32xf32>
    %34 = vector.broadcast %13 : vector<1x32xf32> to vector<8x32xf32>
    %35 = arith.mulf %33, %34 : vector<8x32xf32>
    %36 = vector.broadcast %15 : vector<1x32xf32> to vector<8x32xf32>
    %37 = arith.addf %35, %36 : vector<8x32xf32>
    %c0_17 = arith.constant 0 : index
    %c0_18 = arith.constant 0 : index
    %c0_19 = arith.constant 0 : index
    %38 = vector.load %arg6[%c0_17, %c0_18, %c0_19] : memref<1x32x96xbf16, #tpu.memory_space<vmem>>, vector<1x32x96xbf16>
    %39 = vector.shape_cast %38 : vector<1x32x96xbf16> to vector<32x96xbf16>
    %40 = arith.truncf %37 : vector<8x32xf32> to vector<8x32xbf16>
    %cst_20 = arith.constant dense<0.000000e+00> : vector<8x96xf32>
    %41 = tpu.matmul %40, %39, %cst_20 {dimension_numbers = #tpu.dot_dimension_numbers<[1], [0], [0], [1], [0, 0, 1, 1], [], []>} : vector<8x32xbf16>, vector<32x96xbf16>, vector<8x96xf32> -> vector<8x96xf32>
    %c0_21 = arith.constant 0 : index
    %c0_22 = arith.constant 0 : index
    %c0_23 = arith.constant 0 : index
    %42 = vector.load %arg7[%c0_21, %c0_22, %c0_23] : memref<1x1x96xf32, #tpu.memory_space<vmem>>, vector<1x1x96xf32>
    %43 = vector.shape_cast %42 : vector<1x1x96xf32> to vector<1x96xf32>
    %44 = vector.broadcast %43 : vector<1x96xf32> to vector<8x96xf32>
    %45 = arith.addf %41, %44 : vector<8x96xf32>
    %46 = vector.extract_strided_slice %45 {offsets = [0, 0], sizes = [8, 32], strides = [1, 1]} : vector<8x96xf32> to vector<8x32xf32>
    %47 = vector.extract_strided_slice %45 {offsets = [0, 32], sizes = [8, 32], strides = [1, 1]} : vector<8x96xf32> to vector<8x32xf32>
    %48 = vector.extract_strided_slice %45 {offsets = [0, 64], sizes = [8, 32], strides = [1, 1]} : vector<8x96xf32> to vector<8x32xf32>
    %49 = arith.truncf %46 : vector<8x32xf32> to vector<8x32xbf16>
    %50 = arith.truncf %47 : vector<8x32xf32> to vector<8x32xbf16>
    %51 = arith.truncf %48 : vector<8x32xf32> to vector<8x32xbf16>
    %cst_24 = arith.constant 0.000000e+00 : f32
    %52 = vector.broadcast %cst_24 : f32 to vector<8x32xf32>
    %53 = vector.extract_strided_slice %49 {offsets = [0, 0], sizes = [8, 8], strides = [1, 1]} : vector<8x32xbf16> to vector<8x8xbf16>
    %54 = vector.extract_strided_slice %50 {offsets = [0, 0], sizes = [8, 8], strides = [1, 1]} : vector<8x32xbf16> to vector<8x8xbf16>
    %cst_25 = arith.constant dense<0.000000e+00> : vector<8x8xf32>
    %55 = tpu.matmul %53, %54, %cst_25 {dimension_numbers = #tpu.dot_dimension_numbers<[1], [1], [0], [0], [0, 0, 1, 0], [], []>} : vector<8x8xbf16>, vector<8x8xbf16>, vector<8x8xf32> -> vector<8x8xf32>
    %56 = arith.addf %55, %11 : vector<8x8xf32>
    %cst_26 = arith.constant dense<0xFF800000> : vector<8xf32>
    %57 = vector.multi_reduction <maximumf>, %56, %cst_26 [1] : vector<8x8xf32> to vector<8xf32>
    %58 = vector.shape_cast %57 : vector<8xf32> to vector<8x1xf32>
    %59 = vector.broadcast %58 : vector<8x1xf32> to vector<8x8xf32>
    %60 = arith.subf %56, %59 : vector<8x8xf32>
    %61 = math.exp %60 : vector<8x8xf32>
    %cst_27 = arith.constant dense<0.000000e+00> : vector<8xf32>
    %62 = vector.multi_reduction <add>, %61, %cst_27 [1] : vector<8x8xf32> to vector<8xf32>
    %63 = vector.shape_cast %62 : vector<8xf32> to vector<8x1xf32>
    %64 = tpu.reciprocal %63 {approx = true} : vector<8x1xf32> -> vector<8x1xf32>
    %65 = vector.broadcast %64 : vector<8x1xf32> to vector<8x8xf32>
    %66 = arith.mulf %61, %65 : vector<8x8xf32>
    %67 = arith.truncf %66 : vector<8x8xf32> to vector<8x8xbf16>
    %68 = vector.extract_strided_slice %51 {offsets = [0, 0], sizes = [8, 8], strides = [1, 1]} : vector<8x32xbf16> to vector<8x8xbf16>
    %cst_28 = arith.constant dense<0.000000e+00> : vector<8x8xf32>
    %69 = tpu.matmul %67, %68, %cst_28 {dimension_numbers = #tpu.dot_dimension_numbers<[1], [0], [0], [1], [0, 0, 1, 1], [], []>} : vector<8x8xbf16>, vector<8x8xbf16>, vector<8x8xf32> -> vector<8x8xf32>
    %70 = arith.truncf %69 : vector<8x8xf32> to vector<8x8xbf16>
    %c0_29 = arith.constant 0 : index
    %c0_30 = arith.constant 0 : index
    %c0_31 = arith.constant 0 : index
    %c0_32 = arith.constant 0 : index
    %71 = vector.load %arg8[%c0_29, %c0_30, %c0_31, %c0_32] : memref<1x4x8x32xbf16, #tpu.memory_space<vmem>>, vector<1x1x8x32xbf16>
    %72 = vector.shape_cast %71 : vector<1x1x8x32xbf16> to vector<8x32xbf16>
    %cst_33 = arith.constant dense<0.000000e+00> : vector<8x32xf32>
    %73 = tpu.matmul %70, %72, %cst_33 {dimension_numbers = #tpu.dot_dimension_numbers<[1], [0], [0], [1], [0, 0, 1, 1], [], []>} : vector<8x8xbf16>, vector<8x32xbf16>, vector<8x32xf32> -> vector<8x32xf32>
    %74 = arith.addf %52, %73 : vector<8x32xf32>
    %75 = vector.extract_strided_slice %49 {offsets = [0, 8], sizes = [8, 8], strides = [1, 1]} : vector<8x32xbf16> to vector<8x8xbf16>
    %76 = vector.extract_strided_slice %50 {offsets = [0, 8], sizes = [8, 8], strides = [1, 1]} : vector<8x32xbf16> to vector<8x8xbf16>
    %cst_34 = arith.constant dense<0.000000e+00> : vector<8x8xf32>
    %77 = tpu.matmul %75, %76, %cst_34 {dimension_numbers = #tpu.dot_dimension_numbers<[1], [1], [0], [0], [0, 0, 1, 0], [], []>} : vector<8x8xbf16>, vector<8x8xbf16>, vector<8x8xf32> -> vector<8x8xf32>
    %78 = arith.addf %77, %11 : vector<8x8xf32>
    %cst_35 = arith.constant dense<0xFF800000> : vector<8xf32>
    %79 = vector.multi_reduction <maximumf>, %78, %cst_35 [1] : vector<8x8xf32> to vector<8xf32>
    %80 = vector.shape_cast %79 : vector<8xf32> to vector<8x1xf32>
    %81 = vector.broadcast %80 : vector<8x1xf32> to vector<8x8xf32>
    %82 = arith.subf %78, %81 : vector<8x8xf32>
    %83 = math.exp %82 : vector<8x8xf32>
    %cst_36 = arith.constant dense<0.000000e+00> : vector<8xf32>
    %84 = vector.multi_reduction <add>, %83, %cst_36 [1] : vector<8x8xf32> to vector<8xf32>
    %85 = vector.shape_cast %84 : vector<8xf32> to vector<8x1xf32>
    %86 = tpu.reciprocal %85 {approx = true} : vector<8x1xf32> -> vector<8x1xf32>
    %87 = vector.broadcast %86 : vector<8x1xf32> to vector<8x8xf32>
    %88 = arith.mulf %83, %87 : vector<8x8xf32>
    %89 = arith.truncf %88 : vector<8x8xf32> to vector<8x8xbf16>
    %90 = vector.extract_strided_slice %51 {offsets = [0, 8], sizes = [8, 8], strides = [1, 1]} : vector<8x32xbf16> to vector<8x8xbf16>
    %cst_37 = arith.constant dense<0.000000e+00> : vector<8x8xf32>
    %91 = tpu.matmul %89, %90, %cst_37 {dimension_numbers = #tpu.dot_dimension_numbers<[1], [0], [0], [1], [0, 0, 1, 1], [], []>} : vector<8x8xbf16>, vector<8x8xbf16>, vector<8x8xf32> -> vector<8x8xf32>
    %92 = arith.truncf %91 : vector<8x8xf32> to vector<8x8xbf16>
    %c0_38 = arith.constant 0 : index
    %c1 = arith.constant 1 : index
    %c0_39 = arith.constant 0 : index
    %c0_40 = arith.constant 0 : index
    %93 = vector.load %arg8[%c0_38, %c1, %c0_39, %c0_40] : memref<1x4x8x32xbf16, #tpu.memory_space<vmem>>, vector<1x1x8x32xbf16>
    %94 = vector.shape_cast %93 : vector<1x1x8x32xbf16> to vector<8x32xbf16>
    %cst_41 = arith.constant dense<0.000000e+00> : vector<8x32xf32>
    %95 = tpu.matmul %92, %94, %cst_41 {dimension_numbers = #tpu.dot_dimension_numbers<[1], [0], [0], [1], [0, 0, 1, 1], [], []>} : vector<8x8xbf16>, vector<8x32xbf16>, vector<8x32xf32> -> vector<8x32xf32>
    %96 = arith.addf %74, %95 : vector<8x32xf32>
    %97 = vector.extract_strided_slice %49 {offsets = [0, 16], sizes = [8, 8], strides = [1, 1]} : vector<8x32xbf16> to vector<8x8xbf16>
    %98 = vector.extract_strided_slice %50 {offsets = [0, 16], sizes = [8, 8], strides = [1, 1]} : vector<8x32xbf16> to vector<8x8xbf16>
    %cst_42 = arith.constant dense<0.000000e+00> : vector<8x8xf32>
    %99 = tpu.matmul %97, %98, %cst_42 {dimension_numbers = #tpu.dot_dimension_numbers<[1], [1], [0], [0], [0, 0, 1, 0], [], []>} : vector<8x8xbf16>, vector<8x8xbf16>, vector<8x8xf32> -> vector<8x8xf32>
    %100 = arith.addf %99, %11 : vector<8x8xf32>
    %cst_43 = arith.constant dense<0xFF800000> : vector<8xf32>
    %101 = vector.multi_reduction <maximumf>, %100, %cst_43 [1] : vector<8x8xf32> to vector<8xf32>
    %102 = vector.shape_cast %101 : vector<8xf32> to vector<8x1xf32>
    %103 = vector.broadcast %102 : vector<8x1xf32> to vector<8x8xf32>
    %104 = arith.subf %100, %103 : vector<8x8xf32>
    %105 = math.exp %104 : vector<8x8xf32>
    %cst_44 = arith.constant dense<0.000000e+00> : vector<8xf32>
    %106 = vector.multi_reduction <add>, %105, %cst_44 [1] : vector<8x8xf32> to vector<8xf32>
    %107 = vector.shape_cast %106 : vector<8xf32> to vector<8x1xf32>
    %108 = tpu.reciprocal %107 {approx = true} : vector<8x1xf32> -> vector<8x1xf32>
    %109 = vector.broadcast %108 : vector<8x1xf32> to vector<8x8xf32>
    %110 = arith.mulf %105, %109 : vector<8x8xf32>
    %111 = arith.truncf %110 : vector<8x8xf32> to vector<8x8xbf16>
    %112 = vector.extract_strided_slice %51 {offsets = [0, 16], sizes = [8, 8], strides = [1, 1]} : vector<8x32xbf16> to vector<8x8xbf16>
    %cst_45 = arith.constant dense<0.000000e+00> : vector<8x8xf32>
    %113 = tpu.matmul %111, %112, %cst_45 {dimension_numbers = #tpu.dot_dimension_numbers<[1], [0], [0], [1], [0, 0, 1, 1], [], []>} : vector<8x8xbf16>, vector<8x8xbf16>, vector<8x8xf32> -> vector<8x8xf32>
    %114 = arith.truncf %113 : vector<8x8xf32> to vector<8x8xbf16>
    %c0_46 = arith.constant 0 : index
    %c2 = arith.constant 2 : index
    %c0_47 = arith.constant 0 : index
    %c0_48 = arith.constant 0 : index
    %115 = vector.load %arg8[%c0_46, %c2, %c0_47, %c0_48] : memref<1x4x8x32xbf16, #tpu.memory_space<vmem>>, vector<1x1x8x32xbf16>
    %116 = vector.shape_cast %115 : vector<1x1x8x32xbf16> to vector<8x32xbf16>
    %cst_49 = arith.constant dense<0.000000e+00> : vector<8x32xf32>
    %117 = tpu.matmul %114, %116, %cst_49 {dimension_numbers = #tpu.dot_dimension_numbers<[1], [0], [0], [1], [0, 0, 1, 1], [], []>} : vector<8x8xbf16>, vector<8x32xbf16>, vector<8x32xf32> -> vector<8x32xf32>
    %118 = arith.addf %96, %117 : vector<8x32xf32>
    %119 = vector.extract_strided_slice %49 {offsets = [0, 24], sizes = [8, 8], strides = [1, 1]} : vector<8x32xbf16> to vector<8x8xbf16>
    %120 = vector.extract_strided_slice %50 {offsets = [0, 24], sizes = [8, 8], strides = [1, 1]} : vector<8x32xbf16> to vector<8x8xbf16>
    %cst_50 = arith.constant dense<0.000000e+00> : vector<8x8xf32>
    %121 = tpu.matmul %119, %120, %cst_50 {dimension_numbers = #tpu.dot_dimension_numbers<[1], [1], [0], [0], [0, 0, 1, 0], [], []>} : vector<8x8xbf16>, vector<8x8xbf16>, vector<8x8xf32> -> vector<8x8xf32>
    %122 = arith.addf %121, %11 : vector<8x8xf32>
    %cst_51 = arith.constant dense<0xFF800000> : vector<8xf32>
    %123 = vector.multi_reduction <maximumf>, %122, %cst_51 [1] : vector<8x8xf32> to vector<8xf32>
    %124 = vector.shape_cast %123 : vector<8xf32> to vector<8x1xf32>
    %125 = vector.broadcast %124 : vector<8x1xf32> to vector<8x8xf32>
    %126 = arith.subf %122, %125 : vector<8x8xf32>
    %127 = math.exp %126 : vector<8x8xf32>
    %cst_52 = arith.constant dense<0.000000e+00> : vector<8xf32>
    %128 = vector.multi_reduction <add>, %127, %cst_52 [1] : vector<8x8xf32> to vector<8xf32>
    %129 = vector.shape_cast %128 : vector<8xf32> to vector<8x1xf32>
    %130 = tpu.reciprocal %129 {approx = true} : vector<8x1xf32> -> vector<8x1xf32>
    %131 = vector.broadcast %130 : vector<8x1xf32> to vector<8x8xf32>
    %132 = arith.mulf %127, %131 : vector<8x8xf32>
    %133 = arith.truncf %132 : vector<8x8xf32> to vector<8x8xbf16>
    %134 = vector.extract_strided_slice %51 {offsets = [0, 24], sizes = [8, 8], strides = [1, 1]} : vector<8x32xbf16> to vector<8x8xbf16>
    %cst_53 = arith.constant dense<0.000000e+00> : vector<8x8xf32>
    %135 = tpu.matmul %133, %134, %cst_53 {dimension_numbers = #tpu.dot_dimension_numbers<[1], [0], [0], [1], [0, 0, 1, 1], [], []>} : vector<8x8xbf16>, vector<8x8xbf16>, vector<8x8xf32> -> vector<8x8xf32>
    %136 = arith.truncf %135 : vector<8x8xf32> to vector<8x8xbf16>
    %c0_54 = arith.constant 0 : index
    %c3 = arith.constant 3 : index
    %c0_55 = arith.constant 0 : index
    %c0_56 = arith.constant 0 : index
    %137 = vector.load %arg8[%c0_54, %c3, %c0_55, %c0_56] : memref<1x4x8x32xbf16, #tpu.memory_space<vmem>>, vector<1x1x8x32xbf16>
    %138 = vector.shape_cast %137 : vector<1x1x8x32xbf16> to vector<8x32xbf16>
    %cst_57 = arith.constant dense<0.000000e+00> : vector<8x32xf32>
    %139 = tpu.matmul %136, %138, %cst_57 {dimension_numbers = #tpu.dot_dimension_numbers<[1], [0], [0], [1], [0, 0, 1, 1], [], []>} : vector<8x8xbf16>, vector<8x32xbf16>, vector<8x32xf32> -> vector<8x32xf32>
    %140 = arith.addf %118, %139 : vector<8x32xf32>
    %141 = arith.addf %3, %140 : vector<8x32xf32>
    %c0_58 = arith.constant 0 : index
    %c0_59 = arith.constant 0 : index
    %c0_60 = arith.constant 0 : index
    %142 = vector.load %arg9[%c0_58, %c0_59, %c0_60] : memref<1x1x32xf32, #tpu.memory_space<vmem>>, vector<1x1x32xf32>
    %143 = vector.shape_cast %142 : vector<1x1x32xf32> to vector<1x32xf32>
    %144 = vector.broadcast %143 : vector<1x32xf32> to vector<8x32xf32>
    %145 = arith.addf %141, %144 : vector<8x32xf32>
    %c0_61 = arith.constant 0 : index
    %c0_62 = arith.constant 0 : index
    %c0_63 = arith.constant 0 : index
    %146 = vector.load %arg10[%c0_61, %c0_62, %c0_63] : memref<1x1x32xf32, #tpu.memory_space<vmem>>, vector<1x1x32xf32>
    %147 = vector.shape_cast %146 : vector<1x1x32xf32> to vector<1x32xf32>
    %c0_64 = arith.constant 0 : index
    %c0_65 = arith.constant 0 : index
    %c0_66 = arith.constant 0 : index
    %148 = vector.load %arg11[%c0_64, %c0_65, %c0_66] : memref<1x1x32xf32, #tpu.memory_space<vmem>>, vector<1x1x32xf32>
    %149 = vector.shape_cast %148 : vector<1x1x32xf32> to vector<1x32xf32>
    %cst_67 = arith.constant dense<0.000000e+00> : vector<8xf32>
    %150 = vector.multi_reduction <add>, %145, %cst_67 [1] : vector<8x32xf32> to vector<8xf32>
    %151 = vector.shape_cast %150 : vector<8xf32> to vector<8x1xf32>
    %cst_68 = arith.constant 3.200000e+01 : f32
    %152 = vector.broadcast %cst_68 : f32 to vector<8x1xf32>
    %153 = arith.divf %151, %152 : vector<8x1xf32>
    %154 = vector.broadcast %153 : vector<8x1xf32> to vector<8x32xf32>
    %155 = arith.subf %145, %154 : vector<8x32xf32>
    %156 = arith.mulf %155, %155 : vector<8x32xf32>
    %cst_69 = arith.constant dense<0.000000e+00> : vector<8xf32>
    %157 = vector.multi_reduction <add>, %156, %cst_69 [1] : vector<8x32xf32> to vector<8xf32>
    %158 = vector.shape_cast %157 : vector<8xf32> to vector<8x1xf32>
    %cst_70 = arith.constant 3.200000e+01 : f32
    %159 = vector.broadcast %cst_70 : f32 to vector<8x1xf32>
    %160 = arith.divf %158, %159 : vector<8x1xf32>
    %161 = vector.broadcast %153 : vector<8x1xf32> to vector<8x32xf32>
    %162 = arith.subf %145, %161 : vector<8x32xf32>
    %cst_71 = arith.constant 9.99999974E-6 : f32
    %163 = vector.broadcast %cst_71 : f32 to vector<8x1xf32>
    %164 = arith.addf %160, %163 : vector<8x1xf32>
    %165 = math.rsqrt %164 : vector<8x1xf32>
    %166 = vector.broadcast %165 : vector<8x1xf32> to vector<8x32xf32>
    %167 = arith.mulf %162, %166 : vector<8x32xf32>
    %168 = vector.broadcast %147 : vector<1x32xf32> to vector<8x32xf32>
    %169 = arith.mulf %167, %168 : vector<8x32xf32>
    %170 = vector.broadcast %149 : vector<1x32xf32> to vector<8x32xf32>
    %171 = arith.addf %169, %170 : vector<8x32xf32>
    %c0_72 = arith.constant 0 : index
    %c0_73 = arith.constant 0 : index
    %c0_74 = arith.constant 0 : index
    %172 = vector.load %arg12[%c0_72, %c0_73, %c0_74] : memref<1x32x32xbf16, #tpu.memory_space<vmem>>, vector<1x32x32xbf16>
    %173 = vector.shape_cast %172 : vector<1x32x32xbf16> to vector<32x32xbf16>
    %174 = arith.truncf %171 : vector<8x32xf32> to vector<8x32xbf16>
    %cst_75 = arith.constant dense<0.000000e+00> : vector<8x32xf32>
    %175 = tpu.matmul %174, %173, %cst_75 {dimension_numbers = #tpu.dot_dimension_numbers<[1], [0], [0], [1], [0, 0, 1, 1], [], []>} : vector<8x32xbf16>, vector<32x32xbf16>, vector<8x32xf32> -> vector<8x32xf32>
    %c0_76 = arith.constant 0 : index
    %c0_77 = arith.constant 0 : index
    %c0_78 = arith.constant 0 : index
    %176 = vector.load %arg13[%c0_76, %c0_77, %c0_78] : memref<1x1x32xf32, #tpu.memory_space<vmem>>, vector<1x1x32xf32>
    %177 = vector.shape_cast %176 : vector<1x1x32xf32> to vector<1x32xf32>
    %178 = vector.broadcast %177 : vector<1x32xf32> to vector<8x32xf32>
    %179 = arith.addf %175, %178 : vector<8x32xf32>
    %c0_79 = arith.constant 0 : index
    %c0_80 = arith.constant 0 : index
    %c0_81 = arith.constant 0 : index
    %180 = vector.load %arg14[%c0_79, %c0_80, %c0_81] : memref<1x32x64xbf16, #tpu.memory_space<vmem>>, vector<1x32x64xbf16>
    %181 = vector.shape_cast %180 : vector<1x32x64xbf16> to vector<32x64xbf16>
    %182 = arith.truncf %5 : vector<16x32xf32> to vector<16x32xbf16>
    %cst_82 = arith.constant dense<0.000000e+00> : vector<16x64xf32>
    %183 = tpu.matmul %182, %181, %cst_82 {dimension_numbers = #tpu.dot_dimension_numbers<[1], [0], [0], [1], [0, 0, 1, 1], [], []>} : vector<16x32xbf16>, vector<32x64xbf16>, vector<16x64xf32> -> vector<16x64xf32>
    %c0_83 = arith.constant 0 : index
    %c0_84 = arith.constant 0 : index
    %c0_85 = arith.constant 0 : index
    %184 = vector.load %arg15[%c0_83, %c0_84, %c0_85] : memref<1x1x64xf32, #tpu.memory_space<vmem>>, vector<1x1x64xf32>
    %185 = vector.shape_cast %184 : vector<1x1x64xf32> to vector<1x64xf32>
    %186 = vector.broadcast %185 : vector<1x64xf32> to vector<16x64xf32>
    %187 = arith.addf %183, %186 : vector<16x64xf32>
    %188 = vector.extract_strided_slice %187 {offsets = [0, 0], sizes = [16, 32], strides = [1, 1]} : vector<16x64xf32> to vector<16x32xf32>
    %189 = vector.extract_strided_slice %187 {offsets = [0, 32], sizes = [16, 32], strides = [1, 1]} : vector<16x64xf32> to vector<16x32xf32>
    %190 = arith.truncf %179 : vector<8x32xf32> to vector<8x32xbf16>
    %191 = arith.truncf %188 : vector<16x32xf32> to vector<16x32xbf16>
    %192 = arith.truncf %189 : vector<16x32xf32> to vector<16x32xbf16>
    %cst_86 = arith.constant 0.000000e+00 : f32
    %193 = vector.broadcast %cst_86 : f32 to vector<8x32xf32>
    %194 = vector.extract_strided_slice %190 {offsets = [0, 0], sizes = [8, 8], strides = [1, 1]} : vector<8x32xbf16> to vector<8x8xbf16>
    %195 = vector.extract_strided_slice %191 {offsets = [0, 0], sizes = [16, 8], strides = [1, 1]} : vector<16x32xbf16> to vector<16x8xbf16>
    %cst_87 = arith.constant dense<0.000000e+00> : vector<8x16xf32>
    %196 = tpu.matmul %194, %195, %cst_87 {dimension_numbers = #tpu.dot_dimension_numbers<[1], [1], [0], [0], [0, 0, 1, 0], [], []>} : vector<8x8xbf16>, vector<16x8xbf16>, vector<8x16xf32> -> vector<8x16xf32>
    %cst_88 = arith.constant dense<0xFF800000> : vector<8xf32>
    %197 = vector.multi_reduction <maximumf>, %196, %cst_88 [1] : vector<8x16xf32> to vector<8xf32>
    %198 = vector.shape_cast %197 : vector<8xf32> to vector<8x1xf32>
    %199 = vector.broadcast %198 : vector<8x1xf32> to vector<8x16xf32>
    %200 = arith.subf %196, %199 : vector<8x16xf32>
    %201 = math.exp %200 : vector<8x16xf32>
    %cst_89 = arith.constant dense<0.000000e+00> : vector<8xf32>
    %202 = vector.multi_reduction <add>, %201, %cst_89 [1] : vector<8x16xf32> to vector<8xf32>
    %203 = vector.shape_cast %202 : vector<8xf32> to vector<8x1xf32>
    %204 = tpu.reciprocal %203 {approx = true} : vector<8x1xf32> -> vector<8x1xf32>
    %205 = vector.broadcast %204 : vector<8x1xf32> to vector<8x16xf32>
    %206 = arith.mulf %201, %205 : vector<8x16xf32>
    %207 = arith.truncf %206 : vector<8x16xf32> to vector<8x16xbf16>
    %208 = vector.extract_strided_slice %192 {offsets = [0, 0], sizes = [16, 8], strides = [1, 1]} : vector<16x32xbf16> to vector<16x8xbf16>
    %cst_90 = arith.constant dense<0.000000e+00> : vector<8x8xf32>
    %209 = tpu.matmul %207, %208, %cst_90 {dimension_numbers = #tpu.dot_dimension_numbers<[1], [0], [0], [1], [0, 0, 1, 1], [], []>} : vector<8x16xbf16>, vector<16x8xbf16>, vector<8x8xf32> -> vector<8x8xf32>
    %210 = arith.truncf %209 : vector<8x8xf32> to vector<8x8xbf16>
    %c0_91 = arith.constant 0 : index
    %c0_92 = arith.constant 0 : index
    %c0_93 = arith.constant 0 : index
    %c0_94 = arith.constant 0 : index
    %211 = vector.load %arg16[%c0_91, %c0_92, %c0_93, %c0_94] : memref<1x4x8x32xbf16, #tpu.memory_space<vmem>>, vector<1x1x8x32xbf16>
    %212 = vector.shape_cast %211 : vector<1x1x8x32xbf16> to vector<8x32xbf16>
    %cst_95 = arith.constant dense<0.000000e+00> : vector<8x32xf32>
    %213 = tpu.matmul %210, %212, %cst_95 {dimension_numbers = #tpu.dot_dimension_numbers<[1], [0], [0], [1], [0, 0, 1, 1], [], []>} : vector<8x8xbf16>, vector<8x32xbf16>, vector<8x32xf32> -> vector<8x32xf32>
    %214 = arith.addf %193, %213 : vector<8x32xf32>
    %215 = vector.extract_strided_slice %190 {offsets = [0, 8], sizes = [8, 8], strides = [1, 1]} : vector<8x32xbf16> to vector<8x8xbf16>
    %216 = vector.extract_strided_slice %191 {offsets = [0, 8], sizes = [16, 8], strides = [1, 1]} : vector<16x32xbf16> to vector<16x8xbf16>
    %cst_96 = arith.constant dense<0.000000e+00> : vector<8x16xf32>
    %217 = tpu.matmul %215, %216, %cst_96 {dimension_numbers = #tpu.dot_dimension_numbers<[1], [1], [0], [0], [0, 0, 1, 0], [], []>} : vector<8x8xbf16>, vector<16x8xbf16>, vector<8x16xf32> -> vector<8x16xf32>
    %cst_97 = arith.constant dense<0xFF800000> : vector<8xf32>
    %218 = vector.multi_reduction <maximumf>, %217, %cst_97 [1] : vector<8x16xf32> to vector<8xf32>
    %219 = vector.shape_cast %218 : vector<8xf32> to vector<8x1xf32>
    %220 = vector.broadcast %219 : vector<8x1xf32> to vector<8x16xf32>
    %221 = arith.subf %217, %220 : vector<8x16xf32>
    %222 = math.exp %221 : vector<8x16xf32>
    %cst_98 = arith.constant dense<0.000000e+00> : vector<8xf32>
    %223 = vector.multi_reduction <add>, %222, %cst_98 [1] : vector<8x16xf32> to vector<8xf32>
    %224 = vector.shape_cast %223 : vector<8xf32> to vector<8x1xf32>
    %225 = tpu.reciprocal %224 {approx = true} : vector<8x1xf32> -> vector<8x1xf32>
    %226 = vector.broadcast %225 : vector<8x1xf32> to vector<8x16xf32>
    %227 = arith.mulf %222, %226 : vector<8x16xf32>
    %228 = arith.truncf %227 : vector<8x16xf32> to vector<8x16xbf16>
    %229 = vector.extract_strided_slice %192 {offsets = [0, 8], sizes = [16, 8], strides = [1, 1]} : vector<16x32xbf16> to vector<16x8xbf16>
    %cst_99 = arith.constant dense<0.000000e+00> : vector<8x8xf32>
    %230 = tpu.matmul %228, %229, %cst_99 {dimension_numbers = #tpu.dot_dimension_numbers<[1], [0], [0], [1], [0, 0, 1, 1], [], []>} : vector<8x16xbf16>, vector<16x8xbf16>, vector<8x8xf32> -> vector<8x8xf32>
    %231 = arith.truncf %230 : vector<8x8xf32> to vector<8x8xbf16>
    %c0_100 = arith.constant 0 : index
    %c1_101 = arith.constant 1 : index
    %c0_102 = arith.constant 0 : index
    %c0_103 = arith.constant 0 : index
    %232 = vector.load %arg16[%c0_100, %c1_101, %c0_102, %c0_103] : memref<1x4x8x32xbf16, #tpu.memory_space<vmem>>, vector<1x1x8x32xbf16>
    %233 = vector.shape_cast %232 : vector<1x1x8x32xbf16> to vector<8x32xbf16>
    %cst_104 = arith.constant dense<0.000000e+00> : vector<8x32xf32>
    %234 = tpu.matmul %231, %233, %cst_104 {dimension_numbers = #tpu.dot_dimension_numbers<[1], [0], [0], [1], [0, 0, 1, 1], [], []>} : vector<8x8xbf16>, vector<8x32xbf16>, vector<8x32xf32> -> vector<8x32xf32>
    %235 = arith.addf %214, %234 : vector<8x32xf32>
    %236 = vector.extract_strided_slice %190 {offsets = [0, 16], sizes = [8, 8], strides = [1, 1]} : vector<8x32xbf16> to vector<8x8xbf16>
    %237 = vector.extract_strided_slice %191 {offsets = [0, 16], sizes = [16, 8], strides = [1, 1]} : vector<16x32xbf16> to vector<16x8xbf16>
    %cst_105 = arith.constant dense<0.000000e+00> : vector<8x16xf32>
    %238 = tpu.matmul %236, %237, %cst_105 {dimension_numbers = #tpu.dot_dimension_numbers<[1], [1], [0], [0], [0, 0, 1, 0], [], []>} : vector<8x8xbf16>, vector<16x8xbf16>, vector<8x16xf32> -> vector<8x16xf32>
    %cst_106 = arith.constant dense<0xFF800000> : vector<8xf32>
    %239 = vector.multi_reduction <maximumf>, %238, %cst_106 [1] : vector<8x16xf32> to vector<8xf32>
    %240 = vector.shape_cast %239 : vector<8xf32> to vector<8x1xf32>
    %241 = vector.broadcast %240 : vector<8x1xf32> to vector<8x16xf32>
    %242 = arith.subf %238, %241 : vector<8x16xf32>
    %243 = math.exp %242 : vector<8x16xf32>
    %cst_107 = arith.constant dense<0.000000e+00> : vector<8xf32>
    %244 = vector.multi_reduction <add>, %243, %cst_107 [1] : vector<8x16xf32> to vector<8xf32>
    %245 = vector.shape_cast %244 : vector<8xf32> to vector<8x1xf32>
    %246 = tpu.reciprocal %245 {approx = true} : vector<8x1xf32> -> vector<8x1xf32>
    %247 = vector.broadcast %246 : vector<8x1xf32> to vector<8x16xf32>
    %248 = arith.mulf %243, %247 : vector<8x16xf32>
    %249 = arith.truncf %248 : vector<8x16xf32> to vector<8x16xbf16>
    %250 = vector.extract_strided_slice %192 {offsets = [0, 16], sizes = [16, 8], strides = [1, 1]} : vector<16x32xbf16> to vector<16x8xbf16>
    %cst_108 = arith.constant dense<0.000000e+00> : vector<8x8xf32>
    %251 = tpu.matmul %249, %250, %cst_108 {dimension_numbers = #tpu.dot_dimension_numbers<[1], [0], [0], [1], [0, 0, 1, 1], [], []>} : vector<8x16xbf16>, vector<16x8xbf16>, vector<8x8xf32> -> vector<8x8xf32>
    %252 = arith.truncf %251 : vector<8x8xf32> to vector<8x8xbf16>
    %c0_109 = arith.constant 0 : index
    %c2_110 = arith.constant 2 : index
    %c0_111 = arith.constant 0 : index
    %c0_112 = arith.constant 0 : index
    %253 = vector.load %arg16[%c0_109, %c2_110, %c0_111, %c0_112] : memref<1x4x8x32xbf16, #tpu.memory_space<vmem>>, vector<1x1x8x32xbf16>
    %254 = vector.shape_cast %253 : vector<1x1x8x32xbf16> to vector<8x32xbf16>
    %cst_113 = arith.constant dense<0.000000e+00> : vector<8x32xf32>
    %255 = tpu.matmul %252, %254, %cst_113 {dimension_numbers = #tpu.dot_dimension_numbers<[1], [0], [0], [1], [0, 0, 1, 1], [], []>} : vector<8x8xbf16>, vector<8x32xbf16>, vector<8x32xf32> -> vector<8x32xf32>
    %256 = arith.addf %235, %255 : vector<8x32xf32>
    %257 = vector.extract_strided_slice %190 {offsets = [0, 24], sizes = [8, 8], strides = [1, 1]} : vector<8x32xbf16> to vector<8x8xbf16>
    %258 = vector.extract_strided_slice %191 {offsets = [0, 24], sizes = [16, 8], strides = [1, 1]} : vector<16x32xbf16> to vector<16x8xbf16>
    %cst_114 = arith.constant dense<0.000000e+00> : vector<8x16xf32>
    %259 = tpu.matmul %257, %258, %cst_114 {dimension_numbers = #tpu.dot_dimension_numbers<[1], [1], [0], [0], [0, 0, 1, 0], [], []>} : vector<8x8xbf16>, vector<16x8xbf16>, vector<8x16xf32> -> vector<8x16xf32>
    %cst_115 = arith.constant dense<0xFF800000> : vector<8xf32>
    %260 = vector.multi_reduction <maximumf>, %259, %cst_115 [1] : vector<8x16xf32> to vector<8xf32>
    %261 = vector.shape_cast %260 : vector<8xf32> to vector<8x1xf32>
    %262 = vector.broadcast %261 : vector<8x1xf32> to vector<8x16xf32>
    %263 = arith.subf %259, %262 : vector<8x16xf32>
    %264 = math.exp %263 : vector<8x16xf32>
    %cst_116 = arith.constant dense<0.000000e+00> : vector<8xf32>
    %265 = vector.multi_reduction <add>, %264, %cst_116 [1] : vector<8x16xf32> to vector<8xf32>
    %266 = vector.shape_cast %265 : vector<8xf32> to vector<8x1xf32>
    %267 = tpu.reciprocal %266 {approx = true} : vector<8x1xf32> -> vector<8x1xf32>
    %268 = vector.broadcast %267 : vector<8x1xf32> to vector<8x16xf32>
    %269 = arith.mulf %264, %268 : vector<8x16xf32>
    %270 = arith.truncf %269 : vector<8x16xf32> to vector<8x16xbf16>
    %271 = vector.extract_strided_slice %192 {offsets = [0, 24], sizes = [16, 8], strides = [1, 1]} : vector<16x32xbf16> to vector<16x8xbf16>
    %cst_117 = arith.constant dense<0.000000e+00> : vector<8x8xf32>
    %272 = tpu.matmul %270, %271, %cst_117 {dimension_numbers = #tpu.dot_dimension_numbers<[1], [0], [0], [1], [0, 0, 1, 1], [], []>} : vector<8x16xbf16>, vector<16x8xbf16>, vector<8x8xf32> -> vector<8x8xf32>
    %273 = arith.truncf %272 : vector<8x8xf32> to vector<8x8xbf16>
    %c0_118 = arith.constant 0 : index
    %c3_119 = arith.constant 3 : index
    %c0_120 = arith.constant 0 : index
    %c0_121 = arith.constant 0 : index
    %274 = vector.load %arg16[%c0_118, %c3_119, %c0_120, %c0_121] : memref<1x4x8x32xbf16, #tpu.memory_space<vmem>>, vector<1x1x8x32xbf16>
    %275 = vector.shape_cast %274 : vector<1x1x8x32xbf16> to vector<8x32xbf16>
    %cst_122 = arith.constant dense<0.000000e+00> : vector<8x32xf32>
    %276 = tpu.matmul %273, %275, %cst_122 {dimension_numbers = #tpu.dot_dimension_numbers<[1], [0], [0], [1], [0, 0, 1, 1], [], []>} : vector<8x8xbf16>, vector<8x32xbf16>, vector<8x32xf32> -> vector<8x32xf32>
    %277 = arith.addf %256, %276 : vector<8x32xf32>
    %278 = arith.addf %145, %277 : vector<8x32xf32>
    %c0_123 = arith.constant 0 : index
    %c0_124 = arith.constant 0 : index
    %c0_125 = arith.constant 0 : index
    %279 = vector.load %arg17[%c0_123, %c0_124, %c0_125] : memref<1x1x32xf32, #tpu.memory_space<vmem>>, vector<1x1x32xf32>
    %280 = vector.shape_cast %279 : vector<1x1x32xf32> to vector<1x32xf32>
    %281 = vector.broadcast %280 : vector<1x32xf32> to vector<8x32xf32>
    %282 = arith.addf %278, %281 : vector<8x32xf32>
    %c0_126 = arith.constant 0 : index
    %c0_127 = arith.constant 0 : index
    %c0_128 = arith.constant 0 : index
    %283 = vector.load %arg18[%c0_126, %c0_127, %c0_128] : memref<1x1x32xf32, #tpu.memory_space<vmem>>, vector<1x1x32xf32>
    %284 = vector.shape_cast %283 : vector<1x1x32xf32> to vector<1x32xf32>
    %c0_129 = arith.constant 0 : index
    %c0_130 = arith.constant 0 : index
    %c0_131 = arith.constant 0 : index
    %285 = vector.load %arg19[%c0_129, %c0_130, %c0_131] : memref<1x1x32xf32, #tpu.memory_space<vmem>>, vector<1x1x32xf32>
    %286 = vector.shape_cast %285 : vector<1x1x32xf32> to vector<1x32xf32>
    %cst_132 = arith.constant dense<0.000000e+00> : vector<8xf32>
    %287 = vector.multi_reduction <add>, %282, %cst_132 [1] : vector<8x32xf32> to vector<8xf32>
    %288 = vector.shape_cast %287 : vector<8xf32> to vector<8x1xf32>
    %cst_133 = arith.constant 3.200000e+01 : f32
    %289 = vector.broadcast %cst_133 : f32 to vector<8x1xf32>
    %290 = arith.divf %288, %289 : vector<8x1xf32>
    %291 = vector.broadcast %290 : vector<8x1xf32> to vector<8x32xf32>
    %292 = arith.subf %282, %291 : vector<8x32xf32>
    %293 = arith.mulf %292, %292 : vector<8x32xf32>
    %cst_134 = arith.constant dense<0.000000e+00> : vector<8xf32>
    %294 = vector.multi_reduction <add>, %293, %cst_134 [1] : vector<8x32xf32> to vector<8xf32>
    %295 = vector.shape_cast %294 : vector<8xf32> to vector<8x1xf32>
    %cst_135 = arith.constant 3.200000e+01 : f32
    %296 = vector.broadcast %cst_135 : f32 to vector<8x1xf32>
    %297 = arith.divf %295, %296 : vector<8x1xf32>
    %298 = vector.broadcast %290 : vector<8x1xf32> to vector<8x32xf32>
    %299 = arith.subf %282, %298 : vector<8x32xf32>
    %cst_136 = arith.constant 9.99999974E-6 : f32
    %300 = vector.broadcast %cst_136 : f32 to vector<8x1xf32>
    %301 = arith.addf %297, %300 : vector<8x1xf32>
    %302 = math.rsqrt %301 : vector<8x1xf32>
    %303 = vector.broadcast %302 : vector<8x1xf32> to vector<8x32xf32>
    %304 = arith.mulf %299, %303 : vector<8x32xf32>
    %305 = vector.broadcast %284 : vector<1x32xf32> to vector<8x32xf32>
    %306 = arith.mulf %304, %305 : vector<8x32xf32>
    %307 = vector.broadcast %286 : vector<1x32xf32> to vector<8x32xf32>
    %308 = arith.addf %306, %307 : vector<8x32xf32>
    %c0_137 = arith.constant 0 : index
    %c0_138 = arith.constant 0 : index
    %c0_139 = arith.constant 0 : index
    %309 = vector.load %arg20[%c0_137, %c0_138, %c0_139] : memref<1x32x64xbf16, #tpu.memory_space<vmem>>, vector<1x32x64xbf16>
    %310 = vector.shape_cast %309 : vector<1x32x64xbf16> to vector<32x64xbf16>
    %311 = arith.truncf %308 : vector<8x32xf32> to vector<8x32xbf16>
    %cst_140 = arith.constant dense<0.000000e+00> : vector<8x64xf32>
    %312 = tpu.matmul %311, %310, %cst_140 {dimension_numbers = #tpu.dot_dimension_numbers<[1], [0], [0], [1], [0, 0, 1, 1], [], []>} : vector<8x32xbf16>, vector<32x64xbf16>, vector<8x64xf32> -> vector<8x64xf32>
    %c0_141 = arith.constant 0 : index
    %c0_142 = arith.constant 0 : index
    %c0_143 = arith.constant 0 : index
    %313 = vector.load %arg21[%c0_141, %c0_142, %c0_143] : memref<1x1x64xf32, #tpu.memory_space<vmem>>, vector<1x1x64xf32>
    %314 = vector.shape_cast %313 : vector<1x1x64xf32> to vector<1x64xf32>
    %315 = vector.broadcast %314 : vector<1x64xf32> to vector<8x64xf32>
    %316 = arith.addf %312, %315 : vector<8x64xf32>
    %cst_144 = arith.constant 5.000000e-01 : f32
    %317 = vector.broadcast %cst_144 : f32 to vector<8x64xf32>
    %318 = arith.mulf %317, %316 : vector<8x64xf32>
    %cst_145 = arith.constant 0.707106769 : f32
    %319 = vector.broadcast %cst_145 : f32 to vector<8x64xf32>
    %320 = arith.mulf %316, %319 : vector<8x64xf32>
    %321 = math.absf %320 : vector<8x64xf32>
    %cst_146 = arith.constant 0.327591091 : f32
    %322 = vector.broadcast %cst_146 : f32 to vector<8x64xf32>
    %323 = arith.mulf %322, %321 : vector<8x64xf32>
    %cst_147 = arith.constant 1.000000e+00 : f32
    %324 = vector.broadcast %cst_147 : f32 to vector<8x64xf32>
    %325 = arith.addf %324, %323 : vector<8x64xf32>
    %cst_148 = arith.constant 1.000000e+00 : f32
    %326 = vector.broadcast %cst_148 : f32 to vector<8x64xf32>
    %327 = arith.divf %326, %325 : vector<8x64xf32>
    %cst_149 = arith.constant 1.06140542 : f32
    %328 = vector.broadcast %cst_149 : f32 to vector<8x64xf32>
    %329 = arith.mulf %328, %327 : vector<8x64xf32>
    %cst_150 = arith.constant -1.45315206 : f32
    %330 = vector.broadcast %cst_150 : f32 to vector<8x64xf32>
    %331 = arith.addf %329, %330 : vector<8x64xf32>
    %332 = arith.mulf %331, %327 : vector<8x64xf32>
    %cst_151 = arith.constant 1.42141378 : f32
    %333 = vector.broadcast %cst_151 : f32 to vector<8x64xf32>
    %334 = arith.addf %332, %333 : vector<8x64xf32>
    %335 = arith.mulf %334, %327 : vector<8x64xf32>
    %cst_152 = arith.constant -0.284496725 : f32
    %336 = vector.broadcast %cst_152 : f32 to vector<8x64xf32>
    %337 = arith.addf %335, %336 : vector<8x64xf32>
    %338 = arith.mulf %337, %327 : vector<8x64xf32>
    %cst_153 = arith.constant 0.254829586 : f32
    %339 = vector.broadcast %cst_153 : f32 to vector<8x64xf32>
    %340 = arith.addf %338, %339 : vector<8x64xf32>
    %341 = arith.mulf %340, %327 : vector<8x64xf32>
    %cst_154 = arith.constant 0.000000e+00 : f32
    %342 = vector.broadcast %cst_154 : f32 to vector<8x64xf32>
    %343 = arith.subf %342, %321 : vector<8x64xf32>
    %344 = arith.mulf %343, %321 : vector<8x64xf32>
    %345 = math.exp %344 : vector<8x64xf32>
    %346 = arith.mulf %341, %345 : vector<8x64xf32>
    %cst_155 = arith.constant 1.000000e+00 : f32
    %347 = vector.broadcast %cst_155 : f32 to vector<8x64xf32>
    %348 = arith.subf %347, %346 : vector<8x64xf32>
    %cst_156 = arith.constant 0.000000e+00 : f32
    %349 = vector.broadcast %cst_156 : f32 to vector<8x64xf32>
    %350 = arith.cmpf oge, %320, %349 : vector<8x64xf32>
    %cst_157 = arith.constant 0.000000e+00 : f32
    %351 = vector.broadcast %cst_157 : f32 to vector<8x64xf32>
    %352 = arith.subf %351, %348 : vector<8x64xf32>
    %353 = arith.select %350, %348, %352 : vector<8x64xi1>, vector<8x64xf32>
    %cst_158 = arith.constant 1.000000e+00 : f32
    %354 = vector.broadcast %cst_158 : f32 to vector<8x64xf32>
    %355 = arith.addf %354, %353 : vector<8x64xf32>
    %356 = arith.mulf %318, %355 : vector<8x64xf32>
    %c0_159 = arith.constant 0 : index
    %c0_160 = arith.constant 0 : index
    %c0_161 = arith.constant 0 : index
    %357 = vector.load %arg22[%c0_159, %c0_160, %c0_161] : memref<1x64x32xbf16, #tpu.memory_space<vmem>>, vector<1x64x32xbf16>
    %358 = vector.shape_cast %357 : vector<1x64x32xbf16> to vector<64x32xbf16>
    %359 = arith.truncf %356 : vector<8x64xf32> to vector<8x64xbf16>
    %cst_162 = arith.constant dense<0.000000e+00> : vector<8x32xf32>
    %360 = tpu.matmul %359, %358, %cst_162 {dimension_numbers = #tpu.dot_dimension_numbers<[1], [0], [0], [1], [0, 0, 1, 1], [], []>} : vector<8x64xbf16>, vector<64x32xbf16>, vector<8x32xf32> -> vector<8x32xf32>
    %361 = arith.addf %282, %360 : vector<8x32xf32>
    %c0_163 = arith.constant 0 : index
    %c0_164 = arith.constant 0 : index
    %c0_165 = arith.constant 0 : index
    %362 = vector.load %arg23[%c0_163, %c0_164, %c0_165] : memref<1x1x32xf32, #tpu.memory_space<vmem>>, vector<1x1x32xf32>
    %363 = vector.shape_cast %362 : vector<1x1x32xf32> to vector<1x32xf32>
    %364 = vector.broadcast %363 : vector<1x32xf32> to vector<8x32xf32>
    %365 = arith.addf %361, %364 : vector<8x32xf32>
    %c0_166 = arith.constant 0 : index
    %c0_167 = arith.constant 0 : index
    %366 = vector.load %arg27[%c0_166, %c0_167] : memref<8x32xf32, #tpu.memory_space<vmem>>, vector<8x32xf32>
    tpu.vector_store %arg27[%c0_166, %c0_167], %365 {strides = array<i32>} : memref<8x32xf32, #tpu.memory_space<vmem>>, vector<8x32xf32>,
    %c1_i32 = arith.constant 1 : i32
    %367 = arith.cmpi eq, %arg1, %c1_i32 : i32
    %368 = arith.extui %367 : i1 to i32
    %c0_i32_168 = arith.constant 0 : i32
    %369 = arith.cmpi ne, %368, %c0_i32_168 : i32
    scf.if %369 {
      %c0_169 = arith.constant 0 : index
      %c0_170 = arith.constant 0 : index
      %370 = vector.load %arg24[%c0_169, %c0_170] : memref<32x128xbf16, #tpu.memory_space<vmem>>, vector<32x128xbf16>
      %371 = arith.truncf %365 : vector<8x32xf32> to vector<8x32xbf16>
      %cst_171 = arith.constant dense<0.000000e+00> : vector<8x128xf32>
      %372 = tpu.matmul %371, %370, %cst_171 {dimension_numbers = #tpu.dot_dimension_numbers<[1], [0], [0], [1], [0, 0, 1, 1], [], []>} : vector<8x32xbf16>, vector<32x128xbf16>, vector<8x128xf32> -> vector<8x128xf32>
      %c0_172 = arith.constant 0 : index
      %c0_173 = arith.constant 0 : index
      %373 = vector.load %arg25[%c0_172, %c0_173] : memref<1x128xf32, #tpu.memory_space<vmem>>, vector<1x128xf32>
      %374 = vector.broadcast %373 : vector<1x128xf32> to vector<8x128xf32>
      %375 = arith.addf %372, %374 : vector<8x128xf32>
      %c0_174 = arith.constant 0 : index
      %c0_175 = arith.constant 0 : index
      %c0_176 = arith.constant 0 : index
      %376 = vector.load %arg26[%c0_174, %c0_175, %c0_176] : memref<1x8x128xf32, #tpu.memory_space<vmem>>, vector<1x8x128xf32>
      %377 = vector.shape_cast %376 : vector<1x8x128xf32> to vector<8x128xf32>
      %378 = vector.shape_cast %375 : vector<8x128xf32> to vector<1x8x128xf32>
      tpu.vector_store %arg26[%c0_174, %c0_175, %c0_176], %378 {strides = array<i32>} : memref<1x8x128xf32, #tpu.memory_space<vmem>>, vector<1x8x128xf32>,
    } else {
    }
    return
  }
  func.func @transform_0(%arg0: i32, %arg1: i32) -> (i32, i32, i32) {
    %c0_i32 = arith.constant 0 : i32
    %c0_i32_0 = arith.constant 0 : i32
    %c0_i32_1 = arith.constant 0 : i32
    return %arg0, %c0_i32, %c0_i32_0 : i32, i32, i32
  }
  func.func @transform_1(%arg0: i32, %arg1: i32) -> (i32, i32, i32) {
    %c0_i32 = arith.constant 0 : i32
    %c0_i32_0 = arith.constant 0 : i32
    %c0_i32_1 = arith.constant 0 : i32
    return %arg0, %c0_i32, %c0_i32_0 : i32, i32, i32
  }
  func.func @transform_2(%arg0: i32, %arg1: i32) -> (i32, i32, i32) {
    %c0_i32 = arith.constant 0 : i32
    %c0_i32_0 = arith.constant 0 : i32
    %c0_i32_1 = arith.constant 0 : i32
    return %arg1, %c0_i32, %c0_i32_0 : i32, i32, i32
  }
  func.func @transform_3(%arg0: i32, %arg1: i32) -> (i32, i32, i32) {
    %c0_i32 = arith.constant 0 : i32
    %c0_i32_0 = arith.constant 0 : i32
    %c0_i32_1 = arith.constant 0 : i32
    return %arg1, %c0_i32, %c0_i32_0 : i32, i32, i32
  }
  func.func @transform_4(%arg0: i32, %arg1: i32) -> (i32, i32, i32) {
    %c0_i32 = arith.constant 0 : i32
    %c0_i32_0 = arith.constant 0 : i32
    %c0_i32_1 = arith.constant 0 : i32
    return %arg1, %c0_i32, %c0_i32_0 : i32, i32, i32
  }
  func.func @transform_5(%arg0: i32, %arg1: i32) -> (i32, i32, i32) {
    %c0_i32 = arith.constant 0 : i32
    %c0_i32_0 = arith.constant 0 : i32
    %c0_i32_1 = arith.constant 0 : i32
    return %arg1, %c0_i32, %c0_i32_0 : i32, i32, i32
  }
  func.func @transform_6(%arg0: i32, %arg1: i32) -> (i32, i32, i32, i32) {
    %c0_i32 = arith.constant 0 : i32
    %c0_i32_0 = arith.constant 0 : i32
    %c0_i32_1 = arith.constant 0 : i32
    %c0_i32_2 = arith.constant 0 : i32
    return %arg1, %c0_i32, %c0_i32_0, %c0_i32_1 : i32, i32, i32, i32
  }
  func.func @transform_7(%arg0: i32, %arg1: i32) -> (i32, i32, i32) {
    %c0_i32 = arith.constant 0 : i32
    %c0_i32_0 = arith.constant 0 : i32
    %c0_i32_1 = arith.constant 0 : i32
    return %arg1, %c0_i32, %c0_i32_0 : i32, i32, i32
  }
  func.func @transform_8(%arg0: i32, %arg1: i32) -> (i32, i32, i32) {
    %c0_i32 = arith.constant 0 : i32
    %c0_i32_0 = arith.constant 0 : i32
    %c0_i32_1 = arith.constant 0 : i32
    return %arg1, %c0_i32, %c0_i32_0 : i32, i32, i32
  }
  func.func @transform_9(%arg0: i32, %arg1: i32) -> (i32, i32, i32) {
    %c0_i32 = arith.constant 0 : i32
    %c0_i32_0 = arith.constant 0 : i32
    %c0_i32_1 = arith.constant 0 : i32
    return %arg1, %c0_i32, %c0_i32_0 : i32, i32, i32
  }
  func.func @transform_10(%arg0: i32, %arg1: i32) -> (i32, i32, i32) {
    %c0_i32 = arith.constant 0 : i32
    %c0_i32_0 = arith.constant 0 : i32
    %c0_i32_1 = arith.constant 0 : i32
    return %arg1, %c0_i32, %c0_i32_0 : i32, i32, i32
  }
  func.func @transform_11(%arg0: i32, %arg1: i32) -> (i32, i32, i32) {
    %c0_i32 = arith.constant 0 : i32
    %c0_i32_0 = arith.constant 0 : i32
    %c0_i32_1 = arith.constant 0 : i32
    return %arg1, %c0_i32, %c0_i32_0 : i32, i32, i32
  }
  func.func @transform_12(%arg0: i32, %arg1: i32) -> (i32, i32, i32) {
    %c0_i32 = arith.constant 0 : i32
    %c0_i32_0 = arith.constant 0 : i32
    %c0_i32_1 = arith.constant 0 : i32
    return %arg1, %c0_i32, %c0_i32_0 : i32, i32, i32
  }
  func.func @transform_13(%arg0: i32, %arg1: i32) -> (i32, i32, i32) {
    %c0_i32 = arith.constant 0 : i32
    %c0_i32_0 = arith.constant 0 : i32
    %c0_i32_1 = arith.constant 0 : i32
    return %arg1, %c0_i32, %c0_i32_0 : i32, i32, i32
  }
  func.func @transform_14(%arg0: i32, %arg1: i32) -> (i32, i32, i32, i32) {
    %c0_i32 = arith.constant 0 : i32
    %c0_i32_0 = arith.constant 0 : i32
    %c0_i32_1 = arith.constant 0 : i32
    %c0_i32_2 = arith.constant 0 : i32
    return %arg1, %c0_i32, %c0_i32_0, %c0_i32_1 : i32, i32, i32, i32
  }
  func.func @transform_15(%arg0: i32, %arg1: i32) -> (i32, i32, i32) {
    %c0_i32 = arith.constant 0 : i32
    %c0_i32_0 = arith.constant 0 : i32
    %c0_i32_1 = arith.constant 0 : i32
    return %arg1, %c0_i32, %c0_i32_0 : i32, i32, i32
  }
  func.func @transform_16(%arg0: i32, %arg1: i32) -> (i32, i32, i32) {
    %c0_i32 = arith.constant 0 : i32
    %c0_i32_0 = arith.constant 0 : i32
    %c0_i32_1 = arith.constant 0 : i32
    return %arg1, %c0_i32, %c0_i32_0 : i32, i32, i32
  }
  func.func @transform_17(%arg0: i32, %arg1: i32) -> (i32, i32, i32) {
    %c0_i32 = arith.constant 0 : i32
    %c0_i32_0 = arith.constant 0 : i32
    %c0_i32_1 = arith.constant 0 : i32
    return %arg1, %c0_i32, %c0_i32_0 : i32, i32, i32
  }
  func.func @transform_18(%arg0: i32, %arg1: i32) -> (i32, i32, i32) {
    %c0_i32 = arith.constant 0 : i32
    %c0_i32_0 = arith.constant 0 : i32
    %c0_i32_1 = arith.constant 0 : i32
    return %arg1, %c0_i32, %c0_i32_0 : i32, i32, i32
  }
  func.func @transform_19(%arg0: i32, %arg1: i32) -> (i32, i32, i32) {
    %c0_i32 = arith.constant 0 : i32
    %c0_i32_0 = arith.constant 0 : i32
    %c0_i32_1 = arith.constant 0 : i32
    return %arg1, %c0_i32, %c0_i32_0 : i32, i32, i32
  }
  func.func @transform_20(%arg0: i32, %arg1: i32) -> (i32, i32, i32) {
    %c0_i32 = arith.constant 0 : i32
    %c0_i32_0 = arith.constant 0 : i32
    %c0_i32_1 = arith.constant 0 : i32
    return %arg1, %c0_i32, %c0_i32_0 : i32, i32, i32
  }
  func.func @transform_21(%arg0: i32, %arg1: i32) -> (i32, i32, i32) {
    %c0_i32 = arith.constant 0 : i32
    %c0_i32_0 = arith.constant 0 : i32
    %c0_i32_1 = arith.constant 0 : i32
    return %arg1, %c0_i32, %c0_i32_0 : i32, i32, i32
  }
  func.func @transform_22(%arg0: i32, %arg1: i32) -> (i32, i32) {
    %c0_i32 = arith.constant 0 : i32
    %c0_i32_0 = arith.constant 0 : i32
    %c0_i32_1 = arith.constant 0 : i32
    return %c0_i32, %c0_i32_0 : i32, i32
  }
  func.func @transform_23(%arg0: i32, %arg1: i32) -> (i32, i32) {
    %c0_i32 = arith.constant 0 : i32
    %c0_i32_0 = arith.constant 0 : i32
    %c0_i32_1 = arith.constant 0 : i32
    return %c0_i32, %c0_i32_0 : i32, i32
  }
  func.func @transform_24(%arg0: i32, %arg1: i32) -> (i32, i32, i32) {
    %c0_i32 = arith.constant 0 : i32
    %c0_i32_0 = arith.constant 0 : i32
    %c0_i32_1 = arith.constant 0 : i32
    return %arg0, %c0_i32, %c0_i32_0 : i32, i32, i32
  }
}

</mosaic_0001>

<bundles_post_ra>
// kernel: transformer_decoder_forward.1
= control target key start
LH: loop header
LB: loop body
LE: loop exit
PB: predicated region body
PF: predicated region fallthrough
CT: control target
= control target key end

     0   :  { %s4542_s0 = inlined_call_operand.vmem [shape: f32[2,8,32], index: 0, kind: input, shape index: {}]   ;;  %s4543_s1 = inlined_call_operand.vmem [shape: f32[2,16,32], index: 1, kind: input, shape index: {}]   ;;  %s4544_s2 = inlined_call_operand.vmem [shape: f32[2,1,32], index: 2, kind: input, shape index: {}]   ;;  %s4545_s3 = inlined_call_operand.vmem [shape: f32[2,1,32], index: 3, kind: input, shape index: {}]   ;;  %s4546_s4 = inlined_call_operand.vmem [shape: bf16[2,32,96], index: 4, kind: input, shape index: {}]   ;;  %s4547_s5 = inlined_call_operand.vmem [shape: f32[2,1,96], index: 5, kind: input, shape index: {}]   ;;  %s4548_s6 = inlined_call_operand.vmem [shape: bf16[2,4,8,32], index: 6, kind: input, shape index: {}]   ;;  %s4549_s7 = inlined_call_operand.vmem [shape: f32[2,1,32], index: 7, kind: input, shape index: {}]   ;;  %s4550_s8 = inlined_call_operand.vmem [shape: f32[2,1,32], index: 8, kind: input, shape index: {}]   ;;  %s4551_s9 = inlined_call_operand.vmem [shape: f32[2,1,32], index: 9, kind: input, shape index: {}]   ;;  %s4552_s10 = inlined_call_operand.vmem [shape: bf16[2,32,32], index: 10, kind: input, shape index: {}]   ;;  %s4553_s11 = inlined_call_operand.vmem [shape: f32[2,1,32], index: 11, kind: input, shape index: {}]   ;;  %s4554_s12 = inlined_call_operand.vmem [shape: bf16[2,32,64], index: 12, kind: input, shape index: {}]   ;;  %s4555_s13 = inlined_call_operand.vmem [shape: f32[2,1,64], index: 13, kind: input, shape index: {}]   ;;  %s4556_s14 = inlined_call_operand.vmem [shape: bf16[2,4,8,32], index: 14, kind: input, shape index: {}]   ;;  %s4557_s15 = inlined_call_operand.vmem [shape: f32[2,1,32], index: 15, kind: input, shape index: {}]   ;;  %s4558_s16 = inlined_call_operand.vmem [shape: f32[2,1,32], index: 16, kind: input, shape index: {}]   ;;  %s4559_s17 = inlined_call_operand.vmem [shape: f32[2,1,32], index: 17, kind: input, shape index: {}]   ;;  %s4560_s18 = inlined_call_operand.vmem [shape: bf16[2,32,64], index: 18, kind: input, shape index: {}]   ;;  %s4561_s19 = inlined_call_operand.vmem [shape: f32[2,1,64], index: 19, kind: input, shape index: {}]   ;;  %s4562_s20 = inlined_call_operand.vmem [shape: bf16[2,64,32], index: 20, kind: input, shape index: {}]   ;;  %s4563_s21 = inlined_call_operand.vmem [shape: f32[2,1,32], index: 21, kind: input, shape index: {}]   ;;  %s4564_s22 = inlined_call_operand.vmem [shape: bf16[32,128], index: 22, kind: input, shape index: {}]   ;;  %s4565_s23 = inlined_call_operand.vmem [shape: f32[1,128], index: 23, kind: input, shape index: {}]   ;;  %s4566_s24 = inlined_call_operand.hbm [shape: f32[2,8,128], index: 24, kind: output, shape index: {}]  }
   0x1   :  { %4585 = sst [smem:[#allocation21_spill]] %s4542_s0 }
   0x2   :  { %4586 = sst [smem:[#allocation22_spill]] %s4543_s1 }
   0x3   :  { %4587 = sst [smem:[#allocation23_spill]] %s4544_s2 }
   0x4   :  { %4588 = sst [smem:[#allocation24_spill]] %s4545_s3 }
   0x5   :  { %4589 = sst [smem:[#allocation25_spill]] %s4546_s4 }
   0x6   :  { %4590 = sst [smem:[#allocation26_spill]] %s4547_s5 }
   0x7   :  { %4591 = sst [smem:[#allocation27_spill]] %s4548_s6 }
   0x8   :  { %4592 = sst [smem:[#allocation28_spill]] %s4549_s7 }
   0x9   :  { %4593 = sst [smem:[#allocation29_spill]] %s4550_s8 }
   0xa   :  { %4594 = sst [smem:[#allocation30_spill]] %s4552_s10 }
   0xb   :  { %4595 = sst [smem:[#allocation31_spill]] %s4553_s11 }
   0xc   :  { %4596 = sst [smem:[#allocation32_spill]] %s4554_s12 }
   0xd   :  { %4597 = sst [smem:[#allocation33_spill]] %s4556_s14 }
   0xe   :  { %4598 = sst [smem:[#allocation34_spill]] %s4557_s15 }
   0xf   :  { %4599 = sst [smem:[#allocation35_spill]] %s4560_s18 }
  0x10   :  { %4600 = sst [smem:[#allocation36_spill]] %s4561_s19 }
  0x11   :  { %4601 = sst [smem:[#allocation37_spill]] %s4562_s20 }
  0x12   :  { %4602 = sst [smem:[#allocation38_spill]] %s4563_s21 }
  0x13   :  { %4603 = sst [smem:[#allocation39_spill]] %s4564_s22 }
  0x14   :  { %4604 = sst [smem:[#allocation40_spill]] %s4565_s23 }
  0x15   :  { %4605 = sst [smem:[#allocation41_spill]] %s4566_s24 }
  0x16   :  { %29 = vsyncpa [#allocation4], 0 }
  0x17   :  { %31 = vsyncpa [#allocation4 + $0x1], 0  ;;  %s3976_s5 = smov 0   ;;  %s3978_s26 = smov 0  }
  0x18   :  { %s3980_s27 = smov 0   ;;  %s3982_s28 = smov 0  }
  0x19   :  { %s3984_s6 = smov 0   ;;  %s3986_s2 = smov 0  }
  0x1a   :  { %s3988_s29 = smov 0   ;;  %s3990_s0 = smov 0  }
  0x1b LB: > { %4606 = sst [smem:[#allocation6_spill]] %s3804_s5  ;;  %s3232_s7 = sadd.s32 4294967295, %s3832_s0   ;;  %s3832_s0 = sphi %s3990_s0, %s37_s0   ;;  %s3828_s29 = sphi %s3988_s29, %s4681_s29   ;;  %s3824_s2 = sphi %s3986_s2, %s4680_s2   ;;  %s3820_s6 = sphi %s3984_s6, %s4679_s6   ;;  %s3816_s28 = sphi %s3982_s28, %s4678_s28   ;;  %s3812_s27 = sphi %s3980_s27, %s4677_s27   ;;  %s3808_s26 = sphi %s3978_s26, %s4676_s26   ;;  %s3804_s5 = sphi %s3976_s5, %s4675_s5  }
  0x1c   : > { %4607 = sst [smem:[#allocation7_spill]] %s3808_s26  ;;  %s3233_s30 = sadd.s32 4294967294, %s3832_s0  }
  0x1d   : > { %4608 = sst [smem:[#allocation8_spill]] %s3812_s27  ;;  %s46_s3 = sadd.s32 1, %s3824_s2 }
  0x1e   : > { %4609 = sst [smem:[#allocation9_spill]] %s3816_s28  ;;  %p47_p0 = scmp.ge.s32.totalorder %s46_s3, 2 }
  0x1f   : > { %4610 = sst [smem:[#allocation10_spill]] %s3820_s6  ;;  %s49_s25 = sadd.s32 1, %s3828_s29 }
  0x20   : > { %4611 = sst [smem:[#allocation11_spill]] %s3824_s2  ;;  %p680_p1 = scmp.ne.s32.totalorder %s3812_s27, %s3808_s26 }
  0x21   : > { %4612 = sst [smem:[#allocation12_spill]] %s3828_s29  ;;  %p681_p2 = scmp.eq.s32.totalorder %s3232_s7, 3 }
  0x22   : > { %4613 = sst [smem:[#allocation13_spill]] %s3832_s0  ;;  %s4683_s3 = smov (%p47_p0, %s46_s3), 0 }
  0x23   : > { %4614 = sst [smem:[#allocation14_spill]] %s4683_s3  ;;  %s4685_s25 = smov (!%p47_p0, %s49_s25), %s3828_s29 }
  0x24   : > { %p4025_p3 = por %p681_p2, %p680_p1  ;;  %p686_p4 = scmp.ne.s32.totalorder %s3808_s26, %s3804_s5 }
  0x25   : > { %p51_p5 = scmp.ge.s32.totalorder %s4685_s25, 2  ;;  %p687_p6 = scmp.eq.s32.totalorder %s3233_s30, 3 }
  0x26   : > { %s4615_s8 = scalar_select %p4025_p3, 1, 0 }
  0x27   : > { %p3236_p7 = scmp.ge.s32.totalorder %s3832_s0, 1  ;;  %p860_p8 = scmp.lt.s32.totalorder %s3832_s0, 5 }
  0x28   : > { %4616 = sst [smem:[#allocation15_spill]] %s4615_s8  ;;  %s4687_s25 = smov (%p51_p5, %s4685_s25), 0 }
  0x29   : > { %4617 = sst [smem:[#allocation16_spill]] %s4687_s25  ;;  %p4035_p9 = por %p687_p6, %p686_p4 }
  0x2a   : > { %p861_p10 = pnand %p3236_p7, %p860_p8  ;;  %s667_s1 = ssub.s32 %s3828_s29, %s4687_s25 }
  0x2b   : > { %s4618_s4 = scalar_select %p4035_p9, 1, 0 }
  0x2c   : > { %s670_s7 = sadd.s32 1, %s3812_s27  ;;  %p668_p11 = scmp.eq.s32.totalorder %s667_s1, 0 }
  0x2d   : > { %4619 = sst [smem:[#allocation17_spill]] %s4618_s4  ;;  %864 = sbr.rel (%p861_p10) target bundleno = 6598 (0x19c6), region = 116 }
  0x2e   : > { %s4043_s3 = scalar_select %p668_p11, %s3812_s27, %s670_s7  }
  0x30   : > { %4620 = sst [smem:[#allocation18_spill]] %s4043_s3 }
  0x32   : > { %s4572_s30 = sand.u32 1, %s3808_s26   ;;  %p1004_p12 = scmp.lt.s32.totalorder %s3820_s6, 1 }
  0x33   : > { %s4049_s2 = sshll.u32 %s4572_s30, 3  ;;  %p1013_p13 = scmp.lt.s32.totalorder %s3816_s28, 1 }
  0x34   : > { %s1005_s4 = scalar_select %p1004_p12, %s3820_s6, 1 }
  0x35   : > { %s4054_s5 = scalar_select %p1013_p13, %s3816_s28, 1 }
  0x36   : > { %s3238_s1 = sshll.u32 %s1005_s4, 3  ;;  %s3325_s7 = sshll.u32 %s1005_s4, 4 }
  0x37   : > { %s4621_s3 = sld [smem:[#allocation21_spill]]  ;;  %s3326_s19 = sshll.u32 %s4054_s5, 4 }
  0x38   : > { %s4622_s24 = sld [smem:[#allocation22_spill]]  ;;  %s3332_s11 = sshll.u32 %s4054_s5, 5 }
  0x39   : > { %s4628_s23 = sld [smem:[#allocation27_spill]]  ;;  %s1003_s20 = scalar_lea.vmem [#allocation3], %s4049_s2 }
  0x3a   : > { %s4631_s10 = sld [smem:[#allocation30_spill]] }
  0x3b   : > { %s4633_s12 = sld [smem:[#allocation32_spill]] }
  0x3c   : > { %s4634_s14 = sld [smem:[#allocation33_spill]] }
  0x3d   : > { %s1007_s30 = scalar_lea.vmem %s4621_s3, %s3238_s1  ;;  %s4637_s18 = sld [smem:[#allocation35_spill]] }
  0x3e   : > { %s4062_s8 = scalar_lea.vmem %s4622_s24, %s3325_s7  ;;  %s4627_s24 = sld [smem:[#allocation25_spill]] }
  0x3f   : > { %4623 = sst [smem:[#allocation19_spill]] %s4062_s8  ;;  %s4085_s7 = scalar_lea.vmem %s4628_s23, %s3326_s19 }
  0x40   : > { %s4102_s26 = scalar_lea.vmem %s4631_s10, %s3326_s19  ;;  %s4639_s3 = sld [smem:[#allocation37_spill]] }
  0x41   : > { %s4111_s4 = scalar_lea.vmem %s4633_s12, %s3326_s19  ;;  %s4640_s21 = sld [smem:[#allocation38_spill]] }
  0x42   : > { %s4120_s0 = scalar_lea.vmem %s4634_s14, %s3326_s19  ;;  %s4638_s14 = sld [smem:[#allocation36_spill]] }
  0x43   : > { %4635 = sst [smem:[#allocation20_spill]] %s4120_s0  ;;  %s4137_s29 = scalar_lea.vmem %s4637_s18, %s3326_s19 }
  0x44   : > { %s4080_s1 = scalar_lea.vmem %s4627_s24, %s3326_s19  ;;  %s4641_s10 = sld [smem:[#allocation9_spill]] }
  0x46   : > { %s4147_s15 = scalar_lea.vmem %s4639_s3, %s3332_s11 }
  0x47   : > { %s1086_s28 = scalar_lea.vmem %s4640_s21, %s4054_s5 }
  0x48   : > { %s1078_s0 = scalar_lea.vmem %s4638_s14, %s4054_s5 }
  0x4a   : > { %p3255_p0 = scmp.ne.s32.totalorder %s4641_s10, 0 }
  0x4c   : > { %1091 = sbr.rel (%p3255_p0) target bundleno = 83 (0x53), region = 120 }
  0x51   : > { %v1092_v0 = vld [vmem:[%s1007_s30] sm:$0xff]  ;;  %vm1093_vm0 = vcmask 261120  }
  0x52   : > { %1094 = vst.msk [vmem:[#allocation2] sm:$0xff] %vm1093_vm0, %v1092_v0 }
  0x53 PF: > { %vm1106_vm1 = vcmask 261120   ;;  %v3684_v8 = vld [vmem:[%s4080_s1 + $0x8] sm:$0xff]   ;;  %v3834_v9 = vmov 0.0   ;;  %vm3835_vm2 = vmmov 0   ;;  %v3685_v10 = vld [vmem:[%s4080_s1] sm:$0xff]   ;;  %s4642_s12 = sld [smem:[#allocation23_spill]]  ;;  %v1098_v33 = vlaneseq }
  0x54   : > { %3401 = vmatprep.subr.bf16.mxu1 %v3834_v9  ;;  %3405 = vmatprep.mubr.msk.bf16.mxu1 %vm3835_vm2, %v3834_v9  ;;  %s4644_s1 = sld [smem:[#allocation24_spill]]  ;;  %s3836_s27 = smov 120   ;;  %vm1206_vm3 = vcmask 64512   ;;  %v3839_v36 = vmov -1e+30   ;;  %vm1270_vm5 = vcmask 1043456  }
  0x55   : > { %3402 = vmatpush3.bf16.msra.mxu1 %v3684_v8  ;;  %3415 = vmatprep.subr.bf16.mxu0 %v3834_v9  ;;  %s4646_s18 = sld [smem:[#allocation26_spill]]  ;;  %s3837_s8 = smov 96   ;;  %v1099_v34 = vshrl.u32 %v1098_v33, 7  ;;  %v1101_v35 = vand.u32 127, %v1098_v33  ;;  %vm2062_vm6 = vcmask 130048   ;;  %vm2809_vm8 = vcmask 523264  }
  0x56   : > { %3403 = vmatprep.subr.bf16.mxu1 %v3834_v9  ;;  %3417 = vmatprep.mubr.msk.bf16.mxu0 %vm3835_vm2, %v3834_v9  ;;  %s3838_s24 = smov 88   ;;  %s3840_s6 = smov 56  }
  0x57   : > { %vm1102_vm4 = vcmp.ge.s32.totalorder %v1099_v34, %v1101_v35  ;;  %s3841_s23 = smov 64   ;;  %s3842_s10 = smov 80  }
  0x58   : > { %v4208_v37 = vsel %vm1102_vm4, 0.0, %v3839_v36  ;;  %s3843_s11 = smov 112   ;;  %s3846_s19 = smov 72  }
  0x59   : > { %v4155_v1 = vld [vmem:[#allocation2] sm:$0xff]  ;;  %3404 = vmatpush3.bf16.msra.mxu1 %v3685_v10  ;;  %s4643_s14 = scalar_lea.vmem %s4642_s12, %s4054_s5  ;;  %s3844_s12 = smov 48  }
  0x5a   : > { %v1107_v2 = vsel %vm1106_vm1, %v4155_v1, 0.0  ;;  %3409 = vmatprep.subr.bf16.mxu1 %v3834_v9  ;;  %v3256_v15 = vld [vmem:[%s4643_s14] ss:$0 sm:$0xff]  ;;  %s4645_s3 = scalar_lea.vmem %s4644_s1, %s4054_s5  ;;  %s3845_s14 = smov 104  }
  0x5b   : > { %1108 = vadd.xlane.f32.xlu0 %v1107_v2  ;;  %v3257_v17 = vld [vmem:[%s4645_s3] ss:$0 sm:$0xff]  ;;  %s4647_s25 = scalar_lea.vmem %s4646_s18, %s4054_s5  ;;  %s3847_s30 = smov 40  }
  0x5c   : > { %v3258_v21 = vld [vmem:[%s4647_s25] ss:$0 sm:$0xff]  ;;  %s4648_s3 = sld [smem:[#allocation28_spill]]  ;;  %s4654_s1 = scalar_lea.vmem %s4555_s13, %s4054_s5 }
  0x5d   : > { %v1315_v10 = vld [vmem:[%s4085_s7] sm:$0xf]  ;;  %s4650_s22 = sld [smem:[#allocation19_spill]]  ;;  %s4660_s18 = scalar_lea.vmem %s4558_s16, %s4054_s5 }
  0x5e   : > { %s4651_s25 = sld [smem:[#allocation29_spill]] }
  0x62   : > { %s4649_s21 = scalar_lea.vmem %s4648_s3, %s4054_s5 }
  0xe4   : > { %v1109_v3 = vpop.xlane.xlu0 %1108 }
  0xe5   : > { %v1111_v4 = vmul.f32 0.03125, %v1109_v3 }
  0xe7   : > { %v1112_v5 = vsub.f32 %v4155_v1, %v1111_v4 }
  0xe9   : > { %v1113_v6 = vmul.f32 %v1112_v5, %v1112_v5 }
  0xeb   : > { %v1114_v7 = vsel %vm1106_vm1, %v1113_v6, 0.0 }
  0xec   : > { %1115 = vadd.xlane.f32.xlu0 %v1114_v7 }
 0x175   : > { %v1116_v11 = vpop.xlane.xlu0 %1115 }
 0x176   : > { %v1117_v12 = vmul.f32 0.03125, %v1116_v11  ;;  %v1479_v11 = vsel %vm1270_vm5, %v1315_v10, 0 }
 0x178   : > { %v1118_v13 = vadd.f32 1e-05, %v1117_v12  ;;  %v3266_v12 = vld [vmem:[%s4085_s7 + $0x4] sm:$0xf] }
 0x17a   : > { %3696 = vrsqrt.f32 %v1118_v13  ;;  %v1433_v13 = vsel %vm1270_vm5, %v3266_v12, 0 }
 0x187   : > { %v3697_v14 = vpop.eup %3696 }
 0x188   : > { %v1120_v16 = vmul.f32 %v3697_v14, %v1112_v5 }
 0x18a   : > { %v1127_v18 = vmul.f32 %v3256_v15, %v1120_v16 }
 0x18c   : > { %v1134_v19 = vadd.f32 %v3257_v17, %v1127_v18 }
 0x18e   : > { %v1139_v20 = vpack.c.bf16 %v1134_v19, %v1134_v19 }
 0x190   : > { %3406 = vmatmul.mubr.msk.bf16.vlgmr.msra.gmra.mxu1 %vm1106_vm1, %v1139_v20 }
 0x191   : > { %3411 = vmatprep.mubr.msk.bf16.mxu1 %vm3835_vm2, %v3834_v9 }
 0x250   : > { %v1196_v22 = vpop.f32.mrf.mxu1 }
 0x251   : > { %v1197_v23 = vadd.f32 %v3258_v21, %v1196_v22 }
 0x252   : > { %v3407_v24 = vpop.f32.mrf.mxu1 }
 0x253   : > { %v4189_v25 = vpack.c.bf16 %v1197_v23, %v1197_v23 }
 0x254   : > { %v1199_v26 = vpop.f32.mrf.mxu1 }
 0x255   : > { %1316 = vrot.lane.b32.xlu0 %v4189_v25, %s3836_s27  ;;  %1204 = vrot.lane.b32.xlu1 %v4189_v25, %s3837_s8 }
 0x256   : > { %v3408_v27 = vpop.f32.mrf.mxu1 }
 0x259   : > { %1318 = vrot.lane.b32.xlu1 %v4189_v25, %s3838_s24 }
 0x2c7   : > { %v1205_v28 = vpop.permute.xlu1 %1204  ;;  %v1317_v32 = vpop.permute.xlu0 %1316 }
 0x2c8   : > { %v1211_v29 = vsel %vm1206_vm3, %v1205_v28, 0 }
 0x2c9   : > { %3410 = vmatpush3.bf16.xpose.msra.mxu1 %v1211_v29 }
 0x2ca   : > { %3421 = vmatprep.subr.bf16.mxu1 %v3834_v9 }
 0x2cb   : > { %v1319_v30 = vpop.permute.xlu1 %1318 }
 0x2cc   : > { %v1324_v31 = vsel %vm1206_vm3, %v1319_v30, 0 }
 0x2d0   : > { %3412 = vmatmul.mubr.msk.bf16.vlgmr.msra.gmra.mxu1 %vm1206_vm3, %v4189_v25 }
 0x2d1   : > { %3422 = vmatpush3.bf16.xpose.msra.mxu1 %v1324_v31  ;;  %3423 = vmatprep.mubr.msk.bf16.mxu1 %vm3835_vm2, %v3834_v9 }
 0x2d2   : > { %3433 = vmatprep.subr.bf16.mxu1 %v3834_v9 }
 0x2d8   : > { %3424 = vmatmul.mubr.msk.bf16.vlgmr.msra.gmra.mxu1 %vm1206_vm3, %v1317_v32 }
 0x2d9   : > { %3435 = vmatprep.mubr.msk.bf16.mxu1 %vm3835_vm2, %v3834_v9  ;;  %3434 = vmatpush3.bf16.msra.mxu1 %v1433_v13 }
 0x2da   : > { %3445 = vmatprep.subr.bf16.mxu1 %v3834_v9 }
 0x390   : > { %v1247_v38 = vpop.f32.mrf.mxu1 }
 0x391   : > { %v1248_v39 = vadd.f32 %v1247_v38, %v4208_v37 }
 0x392   : > { %v3413_v40 = vpop.f32.mrf.mxu1 }
 0x393   : > { %v1253_v41 = vsel %vm1206_vm3, %v1248_v39, -inf }
 0x394   : > { %1254 = vmax.xlane.f32.xlu1 %v1253_v41  ;;  %v1250_v42 = vpop.f32.mrf.mxu1 }
 0x396   : > { %v3414_v43 = vpop.f32.mrf.mxu1 }
 0x398   : > { %v1360_v44 = vpop.f32.mrf.mxu1 }
 0x399   : > { %v1361_v45 = vadd.f32 %v1360_v44, %v4208_v37 }
 0x39a   : > { %v3425_v46 = vpop.f32.mrf.mxu1 }
 0x39b   : > { %v1366_v47 = vsel %vm1206_vm3, %v1361_v45, -inf }
 0x39c   : > { %1367 = vmax.xlane.f32.xlu0 %v1366_v47  ;;  %v1363_v48 = vpop.f32.mrf.mxu1 }
 0x39e   : > { %v3426_v49 = vpop.f32.mrf.mxu1 }
 0x3b2   : > { %1378 = vrot.lane.b32.xlu0 %v4189_v25, %s3840_s6  ;;  %s4652_s6 = scalar_lea.vmem %s4651_s25, %s4054_s5 }
 0x41d   : > { %v1255_v50 = vpop.xlane.xlu1 %1254 }
 0x41e   : > { %v1256_v51 = vsub.f32 %v1248_v39, %v1255_v50 }
 0x420   : > { %v1257_v52 = vmul.f32 1.442695, %v1256_v51 }
 0x422   : > { %3698 = vpow2.f32 %v1257_v52 }
 0x425   : > { %v1368_v53 = vpop.xlane.xlu0 %1367 }
 0x426   : > { %v1369_v54 = vsub.f32 %v1361_v45, %v1368_v53 }
 0x428   : > { %v1370_v55 = vmul.f32 1.442695, %v1369_v54 }
 0x429   : > { %v1379_v3 = vpop.permute.xlu0 %1378 }
 0x42a   : > { %3700 = vpow2.f32 %v1370_v55  ;;  %v1384_v5 = vsel %vm1270_vm5, %v1379_v3, 0 }
 0x42f   : > { %v3699_v56 = vpop.eup %3698 }
 0x430   : > { %v1259_v57 = vsel %vm1206_vm3, %v3699_v56, 0.0 }
 0x431   : > { %1260 = vadd.xlane.f32.xlu1 %v1259_v57 }
 0x437   : > { %v3701_v58 = vpop.eup %3700 }
 0x438   : > { %v1372_v59 = vsel %vm1206_vm3, %v3701_v58, 0.0 }
 0x439   : > { %1373 = vadd.xlane.f32.xlu1 %v1372_v59 }
 0x44a   : > { %1265 = vrot.lane.b32.xlu1 %v4189_v25, %s3841_s23 }
 0x44e   : > { %1523 = vrot.lane.b32.xlu1 %v4189_v25, %s3842_s10 }
 0x452   : > { %1521 = vrot.lane.b32.xlu1 %v4189_v25, %s3843_s11 }
 0x4ba   : > { %v1261_v60 = vpop.xlane.xlu1 %1260 }
 0x4bb   : > { %3702 = vrcp.f32 %v1261_v60 }
 0x4c2   : > { %v1374_v61 = vpop.xlane.xlu1 %1373 }
 0x4c3   : > { %3704 = vrcp.f32 %v1374_v61 }
 0x4c6   : > { %v1266_v62 = vpop.permute.xlu1 %1265 }
 0x4c7   : > { %v1272_v63 = vsel %vm1270_vm5, %v1266_v62, 0 }
 0x4c8   : > { %v3703_v0 = vpop.eup %3702  ;;  %3416 = vmatpush3.bf16.msra.mxu0 %v1272_v63 }
 0x4c9   : > { %3427 = vmatprep.subr.bf16.mxu0 %v3834_v9  ;;  %v1263_v2 = vmul.f32 %v3703_v0, %v3699_v56 }
 0x4ca   : > { %v1524_v19 = vpop.permute.xlu1 %1523 }
 0x4cb   : > { %v1264_v4 = vpack.c.bf16 %v1263_v2, %v1263_v2  ;;  %v1529_v23 = vsel %vm1206_vm3, %v1524_v19, 0 }
 0x4cd   : > { %3418 = vmatmul.mubr.msk.bf16.vlgmr.msra.gmra.mxu0 %vm1206_vm3, %v1264_v4 }
 0x4ce   : > { %3428 = vmatpush3.bf16.msra.mxu0 %v1384_v5  ;;  %3429 = vmatprep.mubr.msk.bf16.mxu0 %vm3835_vm2, %v3834_v9  ;;  %v1522_v27 = vpop.permute.xlu1 %1521 }
 0x4cf   : > { %3439 = vmatprep.subr.bf16.mxu0 %v3834_v9 }
 0x4d0   : > { %v3705_v6 = vpop.eup %3704 }
 0x4d1   : > { %v1376_v7 = vmul.f32 %v3705_v6, %v3701_v58  ;;  %v3271_v58 = vld [vmem:[%s4085_s7 + $0x8] sm:$0xf] }
 0x4d2   : > { %v1638_v59 = vsel %vm1270_vm5, %v3271_v58, 0 }
 0x4d3   : > { %v1377_v8 = vpack.c.bf16 %v1376_v7, %v1376_v7 }
 0x4d5   : > { %3430 = vmatmul.mubr.msk.bf16.vlgmr.msra.gmra.mxu0 %vm1206_vm3, %v1377_v8 }
 0x4d6   : > { %3441 = vmatprep.mubr.msk.bf16.mxu0 %vm3835_vm2, %v3834_v9  ;;  %3440 = vmatpush3.bf16.msra.mxu0 %v1479_v11 }
 0x4d7   : > { %3451 = vmatprep.subr.bf16.mxu0 %v3834_v9 }
 0x58d   : > { %v1308_v14 = vpop.f32.mrf.mxu0 }
 0x58e   : > { %v1314_v15 = vpack.c.bf16 %v1308_v14, %v1308_v14 }
 0x58f   : > { %v3419_v16 = vpop.f32.mrf.mxu0 }
 0x590   : > { %3442 = vmatmul.mubr.msk.bf16.vlgmr.msra.gmra.mxu0 %vm1206_vm3, %v1314_v15  ;;  %v3275_v16 = vld [vmem:[%s4085_s7 + $0xc] sm:$0xf]  ;;  %s4664_s7 = sld [smem:[#allocation9_spill]] }
 0x591   : > { %v1311_v17 = vpop.f32.mrf.mxu0  ;;  %3453 = vmatprep.mubr.msk.bf16.mxu0 %vm3835_vm2, %v3834_v9 }
 0x592   : > { %v1798_v17 = vsel %vm1270_vm5, %v3275_v16, 0 }
 0x593   : > { %v3420_v18 = vpop.f32.mrf.mxu0 }
 0x595   : > { %v1420_v20 = vpop.f32.mrf.mxu0 }
 0x596   : > { %v1426_v21 = vpack.c.bf16 %v1420_v20, %v1420_v20  ;;  %p3316_p1 = scmp.ne.s32.totalorder %s4664_s7, 1 }
 0x597   : > { %v3431_v22 = vpop.f32.mrf.mxu0 }
 0x598   : > { %3436 = vmatmul.mubr.msk.bf16.vlgmr.msra.gmra.mxu1 %vm1206_vm3, %v1426_v21 }
 0x599   : > { %3446 = vmatpush3.bf16.xpose.msra.mxu1 %v1529_v23  ;;  %v1423_v24 = vpop.f32.mrf.mxu0  ;;  %3447 = vmatprep.mubr.msk.bf16.mxu1 %vm3835_vm2, %v3834_v9 }
 0x59a   : > { %3457 = vmatprep.subr.bf16.mxu1 %v3834_v9 }
 0x59b   : > { %v3432_v26 = vpop.f32.mrf.mxu0 }
 0x5a0   : > { %3448 = vmatmul.mubr.msk.bf16.vlgmr.msra.gmra.mxu1 %vm1206_vm3, %v1522_v27 }
 0x5a1   : > { %3459 = vmatprep.mubr.msk.bf16.mxu1 %vm3835_vm2, %v3834_v9  ;;  %3458 = vmatpush3.bf16.msra.mxu1 %v1638_v59 }
 0x5a2   : > { %3469 = vmatprep.subr.bf16.mxu1 %v3834_v9 }
 0x650   : > { %v1515_v28 = vpop.f32.mrf.mxu0 }
 0x652   : > { %v3443_v29 = vpop.f32.mrf.mxu0 }
 0x654   : > { %v1518_v30 = vpop.f32.mrf.mxu0 }
 0x656   : > { %v3444_v31 = vpop.f32.mrf.mxu0 }
 0x658   : > { %v1469_v32 = vpop.f32.mrf.mxu1 }
 0x659   : > { %v4249_v33 = vadd.f32 %v1515_v28, %v1469_v32 }
 0x65a   : > { %v3437_v34 = vpop.f32.mrf.mxu1 }
 0x65c   : > { %v1472_v35 = vpop.f32.mrf.mxu1 }
 0x65e   : > { %v3438_v36 = vpop.f32.mrf.mxu1 }
 0x660   : > { %v1565_v38 = vpop.f32.mrf.mxu1 }
 0x661   : > { %v1566_v39 = vadd.f32 %v1565_v38, %v4208_v37 }
 0x662   : > { %v3449_v40 = vpop.f32.mrf.mxu1 }
 0x663   : > { %v1571_v41 = vsel %vm1206_vm3, %v1566_v39, -inf }
 0x664   : > { %1572 = vmax.xlane.f32.xlu1 %v1571_v41  ;;  %v1568_v42 = vpop.f32.mrf.mxu1 }
 0x666   : > { %v3450_v43 = vpop.f32.mrf.mxu1 }
 0x675   : > { %1583 = vrot.lane.b32.xlu1 %v4189_v25, %s3844_s12 }
 0x679   : > { %1681 = vrot.lane.b32.xlu1 %v4189_v25, %s3845_s14 }
 0x6ed   : > { %v1573_v44 = vpop.xlane.xlu1 %1572 }
 0x6ee   : > { %v1574_v45 = vsub.f32 %v1566_v39, %v1573_v44 }
 0x6f0   : > { %v1575_v46 = vmul.f32 1.442695, %v1574_v45 }
 0x6f1   : > { %v1584_v47 = vpop.permute.xlu1 %1583 }
 0x6f2   : > { %3706 = vpow2.f32 %v1575_v46  ;;  %v1589_v48 = vsel %vm1270_vm5, %v1584_v47, 0  ;;  %v3687_v46 = vld [vmem:[%s4111_s4] sm:$0xff]  }
 0x6f3   : > { %3452 = vmatpush3.bf16.msra.mxu0 %v1589_v48  ;;  %v1096_v47 = vld [vmem:[%s4650_s22] sm:$0xff]  ;;  %v1097_v48 = vld [vmem:[%s4650_s22 + $0x8] sm:$0xff]  ;;  %s4655_s22 = sld [smem:[#allocation31_spill]] }
 0x6f4   : > { %3463 = vmatprep.subr.bf16.mxu0 %v3834_v9 }
 0x6f5   : > { %v1682_v57 = vpop.permute.xlu1 %1681 }
 0x6ff   : > { %v3707_v49 = vpop.eup %3706 }
 0x700   : > { %v1577_v50 = vsel %vm1206_vm3, %v3707_v49, 0.0 }
 0x701   : > { %1578 = vadd.xlane.f32.xlu0 %v1577_v50  ;;  %v3688_v50 = vld [vmem:[%s4102_s26 + $0x8] sm:$0xff]  }
 0x717   : > { %1683 = vrot.lane.b32.xlu0 %v4189_v25, %s3846_s19 }
 0x78a   : > { %v1579_v51 = vpop.xlane.xlu0 %1578 }
 0x78b   : > { %3708 = vrcp.f32 %v1579_v51  ;;  %v3689_v51 = vld [vmem:[%s4102_s26] sm:$0xff]   ;;  %s4653_s26 = scalar_lea.vmem %s4551_s9, %s4054_s5 }
 0x78c   : > { %v3279_v58 = vld [vmem:[%s4653_s26] ss:$0 sm:$0xff] }
 0x78e   : > { %v1684_v54 = vpop.permute.xlu0 %1683 }
 0x78f   : > { %v1689_v56 = vsel %vm1206_vm3, %v1684_v54, 0 }
 0x798   : > { %v3709_v52 = vpop.eup %3708 }
 0x799   : > { %v1581_v53 = vmul.f32 %v3709_v52, %v3707_v49  ;;  %v1950_v49 = vpack.c.bf16 %v1097_v48, %v1096_v47 }
 0x79b   : > { %v1582_v55 = vpack.c.bf16 %v1581_v53, %v1581_v53 }
 0x79d   : > { %3454 = vmatmul.mubr.msk.bf16.vlgmr.msra.gmra.mxu0 %vm1206_vm3, %v1582_v55 }
 0x79e   : > { %3464 = vmatpush3.bf16.xpose.msra.mxu0 %v1689_v56  ;;  %3465 = vmatprep.mubr.msk.bf16.mxu0 %vm3835_vm2, %v3834_v9  ;;  %v3278_v56 = vld [vmem:[%s4652_s6] ss:$0 sm:$0xff] }
 0x79f   : > { %3475 = vmatprep.subr.bf16.mxu0 %v3834_v9 }
 0x7a5   : > { %3466 = vmatmul.mubr.msk.bf16.vlgmr.msra.gmra.mxu0 %vm1206_vm3, %v1682_v57 }
 0x7a6   : > { %3477 = vmatprep.mubr.msk.bf16.mxu0 %vm3835_vm2, %v3834_v9  ;;  %3476 = vmatpush3.bf16.msra.mxu0 %v1798_v17 }
 0x7a7   : > { %3489 = vmatprep.subr.bf16.mxu0 %v3834_v9 }
 0x85d   : > { %v1625_v60 = vpop.f32.mrf.mxu0 }
 0x85e   : > { %v1631_v61 = vpack.c.bf16 %v1625_v60, %v1625_v60 }
 0x85f   : > { %v3455_v62 = vpop.f32.mrf.mxu0 }
 0x860   : > { %3460 = vmatmul.mubr.msk.bf16.vlgmr.msra.gmra.mxu1 %vm1206_vm3, %v1631_v61  ;;  %v3284_v62 = vld [vmem:[%s4654_s1] ss:$0 sm:$0xff] }
 0x861   : > { %v1628_v63 = vpop.f32.mrf.mxu0  ;;  %3471 = vmatprep.mubr.msk.bf16.mxu1 %vm3835_vm2, %v3834_v9 }
 0x863   : > { %v3456_v0 = vpop.f32.mrf.mxu0 }
 0x865   : > { %v1725_v2 = vpop.f32.mrf.mxu0 }
 0x866   : > { %v1726_v3 = vadd.f32 %v1725_v2, %v4208_v37 }
 0x867   : > { %v3467_v4 = vpop.f32.mrf.mxu0 }
 0x868   : > { %v1731_v5 = vsel %vm1206_vm3, %v1726_v3, -inf }
 0x869   : > { %1732 = vmax.xlane.f32.xlu1 %v1731_v5  ;;  %v1728_v6 = vpop.f32.mrf.mxu0 }
 0x86b   : > { %v3468_v7 = vpop.f32.mrf.mxu0 }
 0x8f2   : > { %v1733_v8 = vpop.xlane.xlu1 %1732 }
 0x8f3   : > { %v1734_v10 = vsub.f32 %v1726_v3, %v1733_v8 }
 0x8f5   : > { %v1735_v11 = vmul.f32 1.442695, %v1734_v10 }
 0x8f7   : > { %3710 = vpow2.f32 %v1735_v11 }
 0x904   : > { %v3711_v12 = vpop.eup %3710 }
 0x905   : > { %v1737_v13 = vsel %vm1206_vm3, %v3711_v12, 0.0 }
 0x906   : > { %1738 = vadd.xlane.f32.xlu0 %v1737_v13 }
 0x91c   : > { %1743 = vrot.lane.b32.xlu0 %v4189_v25, %s3847_s30 }
 0x920   : > { %v1674_v14 = vpop.f32.mrf.mxu1 }
 0x921   : > { %v1680_v37 = vadd.f32 %v1674_v14, %v4249_v33  ;;  %v3277_v33 = vld [vmem:[%s4649_s21] ss:$0 sm:$0xff]  ;;  %s4665_s21 = sld [smem:[#allocation39_spill]] (!%p3316_p1) }
 0x922   : > { %v3461_v15 = vpop.f32.mrf.mxu1 }
 0x924   : > { %v1677_v18 = vpop.f32.mrf.mxu1 }
 0x926   : > { %v3462_v19 = vpop.f32.mrf.mxu1 }
 0x98f   : > { %v1739_v20 = vpop.xlane.xlu0 %1738 }
 0x990   : > { %3712 = vrcp.f32 %v1739_v20 }
 0x993   : > { %v1744_v21 = vpop.permute.xlu0 %1743 }
 0x994   : > { %v1749_v22 = vsel %vm1270_vm5, %v1744_v21, 0 }
 0x995   : > { %3470 = vmatpush3.bf16.msra.mxu1 %v1749_v22 }
 0x996   : > { %3481 = vmatprep.subr.bf16.mxu1 %v3834_v9 }
 0x99d   : > { %v3713_v25 = vpop.eup %3712 }
 0x99e   : > { %v1741_v23 = vmul.f32 %v3713_v25, %v3711_v12 }
 0x9a0   : > { %v1742_v24 = vpack.c.bf16 %v1741_v23, %v1741_v23 }
 0x9a2   : > { %3472 = vmatmul.mubr.msk.bf16.vlgmr.msra.gmra.mxu1 %vm1206_vm3, %v1742_v24 }
 0x9a3   : > { %3485 = vmatprep.mubr.msk.bf16.mxu1 %vm3835_vm2, %v3834_v9  ;;  %3482 = vmatpush3.bf16.msra.mxu1 %v3688_v50 }
 0x9a4   : > { %3483 = vmatprep.subr.bf16.mxu1 %v3834_v9 }
 0x9a7   : > { %3484 = vmatpush3.bf16.msra.mxu1 %v3689_v51 }
 0x9a8   : > { %3497 = vmatprep.subr.bf16.mxu1 %v3834_v9 }
 0xa62   : > { %v1785_v26 = vpop.f32.mrf.mxu1 }
 0xa63   : > { %v1791_v27 = vpack.c.bf16 %v1785_v26, %v1785_v26 }
 0xa64   : > { %v3473_v28 = vpop.f32.mrf.mxu1 }
 0xa65   : > { %3478 = vmatmul.mubr.msk.bf16.vlgmr.msra.gmra.mxu0 %vm1206_vm3, %v1791_v27 }
 0xa66   : > { %v1788_v29 = vpop.f32.mrf.mxu1  ;;  %3493 = vmatprep.mubr.msk.bf16.mxu0 %vm3835_vm2, %v3834_v9 }
 0xa68   : > { %v3474_v30 = vpop.f32.mrf.mxu1 }
 0xb25   : > { %v1834_v31 = vpop.f32.mrf.mxu0 }
 0xb26   : > { %v1840_v32 = vadd.f32 %v1834_v31, %v1680_v37 }
 0xb27   : > { %v3479_v34 = vpop.f32.mrf.mxu0 }
 0xb28   : > { %v1841_v35 = vadd.f32 %v1840_v32, %v4155_v1  ;;  %v3686_v1 = vld [vmem:[%s4111_s4 + $0x8] sm:$0xff]   ;;  %s4656_s4 = scalar_lea.vmem %s4655_s22, %s4054_s5 }
 0xb29   : > { %v1837_v36 = vpop.f32.mrf.mxu0  ;;  %3490 = vmatpush3.bf16.msra.mxu0 %v3686_v1  ;;  %v3280_v8 = vld [vmem:[%s4656_s4] ss:$0 sm:$0xff] }
 0xb2a   : > { %v4297_v38 = vadd.f32 %v3277_v33, %v1841_v35  ;;  %3491 = vmatprep.subr.bf16.mxu0 %v3834_v9 }
 0xb2b   : > { %v3480_v39 = vpop.f32.mrf.mxu0 }
 0xb2c   : > { %v1852_v40 = vsel %vm1106_vm1, %v4297_v38, 0.0 }
 0xb2d   : > { %1853 = vadd.xlane.f32.xlu1 %v1852_v40  ;;  %3492 = vmatpush3.bf16.msra.mxu0 %v3687_v46 }
 0xb2e   : > { %3503 = vmatprep.subr.bf16.mxu0 %v3834_v9 }
 0xb30   : > { %3494 = vmatmul.mubr.msk.bf16.vlgmr.msra.gmra.mxu0 %vm1106_vm1, %v1950_v49 }
 0xb31   : > { %3505 = vmatprep.mubr.msk.bf16.mxu0 %vm3835_vm2, %v3834_v9 }
 0xbb6   : > { %v1854_v41 = vpop.xlane.xlu1 %1853 }
 0xbb7   : > { %v1855_v42 = vmul.f32 0.03125, %v1854_v41 }
 0xbb9   : > { %v1856_v43 = vsub.f32 %v4297_v38, %v1855_v42 }
 0xbbb   : > { %v1857_v44 = vmul.f32 %v1856_v43, %v1856_v43 }
 0xbbd   : > { %v1858_v45 = vsel %vm1106_vm1, %v1857_v44, 0.0 }
 0xbbe   : > { %1859 = vadd.xlane.f32.xlu1 %v1858_v45 }
 0xbf0   : > { %v2007_v63 = vpop.f32.mrf.mxu0 }
 0xbf1   : > { %v2008_v2 = vadd.f32 %v3284_v62, %v2007_v63 }
 0xbf2   : > { %v3495_v0 = vpop.f32.mrf.mxu0 }
 0xbf4   : > { %v2010_v3 = vpop.f32.mrf.mxu0 }
 0xbf5   : > { %v2011_v4 = vadd.f32 %v3284_v62, %v2010_v3 }
 0xbf6   : > { %v3496_v5 = vpop.f32.mrf.mxu0 }
 0xbf7   : > { %v4334_v6 = vpack.c.bf16 %v2011_v4, %v2008_v2 }
 0xbf9   : > { %2127 = vrot.lane.b32.xlu1 %v4334_v6, %s3836_s27  ;;  %v2020_v7 = vsel %vm1206_vm3, %v4334_v6, 0 }
 0xc47   : > { %v1860_v52 = vpop.xlane.xlu1 %1859 }
 0xc48   : > { %v1861_v53 = vmul.f32 0.03125, %v1860_v52 }
 0xc4a   : > { %v1862_v54 = vadd.f32 1e-05, %v1861_v53 }
 0xc4c   : > { %3714 = vrsqrt.f32 %v1862_v54 }
 0xc59   : > { %v3715_v55 = vpop.eup %3714 }
 0xc5a   : > { %v1864_v57 = vmul.f32 %v3715_v55, %v1856_v43 }
 0xc5c   : > { %v1871_v59 = vmul.f32 %v3278_v56, %v1864_v57 }
 0xc5e   : > { %v1878_v60 = vadd.f32 %v3279_v58, %v1871_v59 }
 0xc60   : > { %v1883_v61 = vpack.c.bf16 %v1878_v60, %v1878_v60 }
 0xc62   : > { %3486 = vmatmul.mubr.msk.bf16.vlgmr.msra.gmra.mxu1 %vm1106_vm1, %v1883_v61 }
 0xc63   : > { %3499 = vmatprep.mubr.msk.bf16.mxu1 %vm3835_vm2, %v3834_v9  ;;  %3498 = vmatpush3.bf16.xpose.msra.mxu1 %v2020_v7 }
 0xc64   : > { %3509 = vmatprep.subr.bf16.mxu1 %v3834_v9 }
 0xc6b   : > { %v2128_v11 = vpop.permute.xlu1 %2127 }
 0xc6c   : > { %v2133_v37 = vsel %vm1206_vm3, %v2128_v11, 0 }
 0xd22   : > { %v1940_v10 = vpop.f32.mrf.mxu1 }
 0xd23   : > { %v1941_v12 = vadd.f32 %v3280_v8, %v1940_v10 }
 0xd24   : > { %v3487_v13 = vpop.f32.mrf.mxu1 }
 0xd25   : > { %v4346_v14 = vpack.c.bf16 %v1941_v12, %v1941_v12 }
 0xd26   : > { %v1943_v15 = vpop.f32.mrf.mxu1 }
 0xd27   : > { %2125 = vrot.lane.b32.xlu0 %v4346_v14, %s3836_s27  ;;  %3500 = vmatmul.mubr.msk.bf16.vlgmr.msra.gmra.mxu1 %vm1206_vm3, %v4346_v14  ;;  %s4657_s27 = sld [smem:[#allocation20_spill]] }
 0xd28   : > { %v3488_v16 = vpop.f32.mrf.mxu1  ;;  %3510 = vmatpush3.bf16.xpose.msra.mxu1 %v2133_v37  ;;  %3511 = vmatprep.mubr.msk.bf16.mxu1 %vm3835_vm2, %v3834_v9 }
 0xd29   : > { %3521 = vmatprep.subr.bf16.mxu1 %v3834_v9 }
 0xd2d   : > { %v3292_v45 = vld [vmem:[%s4657_s27 + $0x4] sm:$0xf]  ;;  %v2123_v49 = vld [vmem:[%s4657_s27] sm:$0xf] }
 0xd2e   : > { %v2240_v1 = vsel %vm1270_vm5, %v3292_v45, 0  ;;  %v2286_v52 = vsel %vm1270_vm5, %v2123_v49, 0 }
 0xd99   : > { %v2126_v17 = vpop.permute.xlu0 %2125 }
 0xd9a   : > { %3512 = vmatmul.mubr.msk.bf16.vlgmr.msra.gmra.mxu1 %vm1206_vm3, %v2126_v17 }
 0xd9b   : > { %3523 = vmatprep.mubr.msk.bf16.mxu1 %vm3835_vm2, %v3834_v9  ;;  %3522 = vmatpush3.bf16.msra.mxu1 %v2240_v1 }
 0xd9c   : > { %3533 = vmatprep.subr.bf16.mxu1 %v3834_v9 }
 0xde7   : > { %v2056_v18 = vpop.f32.mrf.mxu1 }
 0xde8   : > { %v2063_v19 = vsel %vm2062_vm6, %v2056_v18, -inf }
 0xde9   : > { %2064 = vmax.xlane.f32.xlu0 %v2063_v19  ;;  %v3501_v20 = vpop.f32.mrf.mxu1 }
 0xdeb   : > { %v2059_v21 = vpop.f32.mrf.mxu1 }
 0xded   : > { %v3502_v22 = vpop.f32.mrf.mxu1 }
 0xe5a   : > { %v2169_v25 = vpop.f32.mrf.mxu1 }
 0xe5b   : > { %v2175_v23 = vsel %vm2062_vm6, %v2169_v25, -inf }
 0xe5c   : > { %2176 = vmax.xlane.f32.xlu1 %v2175_v23  ;;  %v3513_v24 = vpop.f32.mrf.mxu1 }
 0xe5e   : > { %v2172_v26 = vpop.f32.mrf.mxu1 }
 0xe60   : > { %v3514_v27 = vpop.f32.mrf.mxu1 }
 0xe6d   : > { %2076 = vrot.lane.b32.xlu1 %v4334_v6, %s3837_s8 }
 0xe71   : > { %2330 = vrot.lane.b32.xlu1 %v4334_v6, %s3843_s11 }
 0xe72   : > { %v2065_v28 = vpop.xlane.xlu0 %2064 }
 0xe73   : > { %v2066_v29 = vsub.f32 %v2056_v18, %v2065_v28 }
 0xe75   : > { %v2067_v30 = vmul.f32 1.442695, %v2066_v29  ;;  %2328 = vrot.lane.b32.xlu1 %v4346_v14, %s3843_s11 }
 0xe77   : > { %3716 = vpow2.f32 %v2067_v30  ;;  %v3297_v30 = vld [vmem:[%s4657_s27 + $0x8] sm:$0xf] }
 0xe84   : > { %v3717_v31 = vpop.eup %3716 }
 0xe85   : > { %v2069_v32 = vsel %vm2062_vm6, %v3717_v31, 0.0 }
 0xe86   : > { %2070 = vadd.xlane.f32.xlu0 %v2069_v32 }
 0xee5   : > { %v2177_v33 = vpop.xlane.xlu1 %2176 }
 0xee6   : > { %v2178_v34 = vsub.f32 %v2169_v25, %v2177_v33 }
 0xee8   : > { %v2179_v35 = vmul.f32 1.442695, %v2178_v34 }
 0xee9   : > { %v2077_v36 = vpop.permute.xlu1 %2076 }
 0xeea   : > { %3718 = vpow2.f32 %v2179_v35  ;;  %3504 = vmatpush3.bf16.msra.mxu0 %v2077_v36 }
 0xeeb   : > { %3515 = vmatprep.subr.bf16.mxu0 %v3834_v9 }
 0xeed   : > { %v2331_v58 = vpop.permute.xlu1 %2330 }
 0xeee   : > { %v2336_v62 = vsel %vm1206_vm3, %v2331_v58, 0 }
 0xef1   : > { %v2329_v2 = vpop.permute.xlu1 %2328 }
 0xef7   : > { %v3719_v39 = vpop.eup %3718 }
 0xef8   : > { %v2181_v40 = vsel %vm2062_vm6, %v3719_v39, 0.0 }
 0xef9   : > { %2182 = vadd.xlane.f32.xlu0 %v2181_v40 }
 0xf0f   : > { %v2071_v41 = vpop.xlane.xlu0 %2070  ;;  %2187 = vrot.lane.b32.xlu0 %v4334_v6, %s3838_s24 }
 0xf10   : > { %3720 = vrcp.f32 %v2071_v41 }
 0xf1d   : > { %v3721_v42 = vpop.eup %3720 }
 0xf1e   : > { %v2073_v43 = vmul.f32 %v3721_v42, %v3717_v31  ;;  %v2443_v31 = vsel %vm1270_vm5, %v3297_v30, 0  ;;  %v3694_v30 = vld [vmem:[%s4147_s15 + $0x8] sm:$0xff]  }
 0xf20   : > { %v2074_v44 = vpack.c.bf16 %v2073_v43, %v2073_v43 }
 0xf22   : > { %3506 = vmatmul.mubr.msk.bf16.vlgmr.msra.gmra.mxu0 %vm2062_vm6, %v2074_v44 }
 0xf23   : > { %3517 = vmatprep.mubr.msk.bf16.mxu0 %vm3835_vm2, %v3834_v9 }
 0xf82   : > { %v2183_v46 = vpop.xlane.xlu0 %2182 }
 0xf83   : > { %3722 = vrcp.f32 %v2183_v46 }
 0xf86   : > { %v2188_v47 = vpop.permute.xlu0 %2187 }
 0xf87   : > { %3516 = vmatpush3.bf16.msra.mxu0 %v2188_v47 }
 0xf88   : > { %3527 = vmatprep.subr.bf16.mxu0 %v3834_v9 }
 0xf90   : > { %v3723_v48 = vpop.eup %3722 }
 0xf91   : > { %v2185_v50 = vmul.f32 %v3723_v48, %v3719_v39 }
 0xf93   : > { %v2186_v51 = vpack.c.bf16 %v2185_v50, %v2185_v50  ;;  %v3301_v50 = vld [vmem:[%s4657_s27 + $0xc] sm:$0xf]  ;;  %s4666_s27 = sld [smem:[#allocation40_spill]] (!%p3316_p1) }
 0xf95   : > { %3518 = vmatmul.mubr.msk.bf16.vlgmr.msra.gmra.mxu0 %vm2062_vm6, %v2186_v51 }
 0xf96   : > { %3528 = vmatpush3.bf16.msra.mxu0 %v2286_v52  ;;  %3529 = vmatprep.mubr.msk.bf16.mxu0 %vm3835_vm2, %v3834_v9  ;;  %v2601_v52 = vsel %vm1270_vm5, %v3301_v50, 0 }
 0xf97   : > { %3539 = vmatprep.subr.bf16.mxu0 %v3834_v9 }
 0xfe2   : > { %v2116_v53 = vpop.f32.mrf.mxu0 }
 0xfe3   : > { %v2122_v54 = vpack.c.bf16 %v2116_v53, %v2116_v53 }
 0xfe4   : > { %v3507_v55 = vpop.f32.mrf.mxu0 }
 0xfe5   : > { %3530 = vmatmul.mubr.msk.bf16.vlgmr.msra.gmra.mxu0 %vm1206_vm3, %v2122_v54 }
 0xfe6   : > { %v2119_v56 = vpop.f32.mrf.mxu0  ;;  %3541 = vmatprep.mubr.msk.bf16.mxu0 %vm3835_vm2, %v3834_v9 }
 0xfe8   : > { %v3508_v57 = vpop.f32.mrf.mxu0 }
0x1055   : > { %v2227_v59 = vpop.f32.mrf.mxu0 }
0x1056   : > { %v2233_v60 = vpack.c.bf16 %v2227_v59, %v2227_v59 }
0x1057   : > { %v3519_v61 = vpop.f32.mrf.mxu0 }
0x1058   : > { %3524 = vmatmul.mubr.msk.bf16.vlgmr.msra.gmra.mxu1 %vm1206_vm3, %v2233_v60 }
0x1059   : > { %3534 = vmatpush3.bf16.xpose.msra.mxu1 %v2336_v62  ;;  %v2230_v63 = vpop.f32.mrf.mxu0  ;;  %3535 = vmatprep.mubr.msk.bf16.mxu1 %vm3835_vm2, %v3834_v9 }
0x105a   : > { %3545 = vmatprep.subr.bf16.mxu1 %v3834_v9 }
0x105b   : > { %v3520_v0 = vpop.f32.mrf.mxu0 }
0x1060   : > { %3536 = vmatmul.mubr.msk.bf16.vlgmr.msra.gmra.mxu1 %vm1206_vm3, %v2329_v2 }
0x1061   : > { %3547 = vmatprep.mubr.msk.bf16.mxu1 %vm3835_vm2, %v3834_v9  ;;  %3546 = vmatpush3.bf16.msra.mxu1 %v2443_v31  ;;  %v3695_v31 = vld [vmem:[%s4147_s15] sm:$0xff]  }
0x1062   : > { %3557 = vmatprep.subr.bf16.mxu1 %v3834_v9 }
0x10a5   : > { %v4396_v3 = vpop.f32.mrf.mxu0 }
0x10a7   : > { %v3531_v4 = vpop.f32.mrf.mxu0 }
0x10a9   : > { %v2325_v5 = vpop.f32.mrf.mxu0 }
0x10ab   : > { %v3532_v7 = vpop.f32.mrf.mxu0 }
0x1118   : > { %v2276_v8 = vpop.f32.mrf.mxu1 }
0x1119   : > { %v2323_v48 = vadd.f32 %v4396_v3, %v2276_v8 }
0x111a   : > { %v3525_v10 = vpop.f32.mrf.mxu1 }
0x111c   : > { %v2279_v11 = vpop.f32.mrf.mxu1 }
0x111e   : > { %v3526_v12 = vpop.f32.mrf.mxu1 }
0x1120   : > { %v2372_v13 = vpop.f32.mrf.mxu1 }
0x1121   : > { %v2378_v37 = vsel %vm2062_vm6, %v2372_v13, -inf }
0x1122   : > { %2379 = vmax.xlane.f32.xlu0 %v2378_v37  ;;  %v3537_v15 = vpop.f32.mrf.mxu1 }
0x1124   : > { %v2375_v16 = vpop.f32.mrf.mxu1 }
0x1126   : > { %v3538_v17 = vpop.f32.mrf.mxu1 }
0x1138   : > { %2390 = vrot.lane.b32.xlu0 %v4334_v6, %s3842_s10  ;;  %s4658_s10 = sld [smem:[#allocation34_spill]] }
0x113c   : > { %2486 = vrot.lane.b32.xlu0 %v4346_v14, %s3845_s14 }
0x113e   : > { %s4659_s11 = scalar_lea.vmem %s4658_s10, %s4054_s5 }
0x113f   : > { %v3303_v4 = vld [vmem:[%s4659_s11] ss:$0 sm:$0xff] }
0x11ab   : > { %v2380_v18 = vpop.xlane.xlu0 %2379 }
0x11ac   : > { %v2381_v19 = vsub.f32 %v2372_v13, %v2380_v18  ;;  %v3690_v18 = vld [vmem:[%s4137_s29 + $0x8] sm:$0xff]  }
0x11ae   : > { %v2382_v20 = vmul.f32 1.442695, %v2381_v19 }
0x11af   : > { %v2391_v21 = vpop.permute.xlu0 %2390 }
0x11b0   : > { %3724 = vpow2.f32 %v2382_v20  ;;  %3540 = vmatpush3.bf16.msra.mxu0 %v2391_v21 }
0x11b1   : > { %3551 = vmatprep.subr.bf16.mxu0 %v3834_v9 }
0x11b3   : > { %v2487_v29 = vpop.permute.xlu0 %2486 }
0x11bd   : > { %v3725_v22 = vpop.eup %3724 }
0x11be   : > { %v2384_v25 = vsel %vm2062_vm6, %v3725_v22, 0.0 }
0x11bf   : > { %2385 = vadd.xlane.f32.xlu1 %v2384_v25  ;;  %v3304_v25 = vld [vmem:[%s4660_s18] ss:$0 sm:$0xff] }
0x11d0   : > { %2488 = vrot.lane.b32.xlu1 %v4334_v6, %s3845_s14 }
0x1248   : > { %v2386_v23 = vpop.xlane.xlu1 %2385 }
0x1249   : > { %3726 = vrcp.f32 %v2386_v23 }
0x124c   : > { %v2489_v26 = vpop.permute.xlu1 %2488 }
0x124d   : > { %v2494_v28 = vsel %vm1206_vm3, %v2489_v26, 0 }
0x1256   : > { %v3727_v24 = vpop.eup %3726 }
0x1257   : > { %v2388_v14 = vmul.f32 %v3727_v24, %v3725_v22 }
0x1259   : > { %v2389_v27 = vpack.c.bf16 %v2388_v14, %v2388_v14 }
0x125b   : > { %3542 = vmatmul.mubr.msk.bf16.vlgmr.msra.gmra.mxu0 %vm2062_vm6, %v2389_v27 }
0x125c   : > { %3552 = vmatpush3.bf16.xpose.msra.mxu0 %v2494_v28  ;;  %3553 = vmatprep.mubr.msk.bf16.mxu0 %vm3835_vm2, %v3834_v9  ;;  %v3692_v28 = vld [vmem:[%s4147_s15 + $0x18] sm:$0xff]  }
0x125d   : > { %3563 = vmatprep.subr.bf16.mxu0 %v3834_v9 }
0x1263   : > { %3554 = vmatmul.mubr.msk.bf16.vlgmr.msra.gmra.mxu0 %vm1206_vm3, %v2487_v29  ;;  %v3693_v29 = vld [vmem:[%s4147_s15 + $0x10] sm:$0xff]  }
0x1264   : > { %3565 = vmatprep.mubr.msk.bf16.mxu0 %vm3835_vm2, %v3834_v9  ;;  %3564 = vmatpush3.bf16.msra.mxu0 %v2601_v52 }
0x1265   : > { %3577 = vmatprep.subr.bf16.mxu0 %v3834_v9 }
0x131b   : > { %v2430_v32 = vpop.f32.mrf.mxu0 }
0x131c   : > { %v2436_v33 = vpack.c.bf16 %v2430_v32, %v2430_v32  ;;  %v3306_v32 = vld [vmem:[%s1078_s0] ss:$0 sm:$0xff] }
0x131d   : > { %v3543_v34 = vpop.f32.mrf.mxu0 }
0x131e   : > { %3548 = vmatmul.mubr.msk.bf16.vlgmr.msra.gmra.mxu1 %vm1206_vm3, %v2436_v33 }
0x131f   : > { %v2433_v35 = vpop.f32.mrf.mxu0  ;;  %3559 = vmatprep.mubr.msk.bf16.mxu1 %vm3835_vm2, %v3834_v9 }
0x1321   : > { %v3544_v36 = vpop.f32.mrf.mxu0 }
0x1323   : > { %v2530_v39 = vpop.f32.mrf.mxu0 }
0x1324   : > { %v2536_v40 = vsel %vm2062_vm6, %v2530_v39, -inf }
0x1325   : > { %2537 = vmax.xlane.f32.xlu1 %v2536_v40  ;;  %v3555_v41 = vpop.f32.mrf.mxu0 }
0x1327   : > { %v2533_v42 = vpop.f32.mrf.mxu0 }
0x1329   : > { %v3556_v43 = vpop.f32.mrf.mxu0 }
0x13ae   : > { %v2538_v44 = vpop.xlane.xlu1 %2537 }
0x13af   : > { %v2539_v45 = vsub.f32 %v2530_v39, %v2538_v44 }
0x13b1   : > { %v2540_v1 = vmul.f32 1.442695, %v2539_v45 }
0x13b3   : > { %3728 = vpow2.f32 %v2540_v1 }
0x13c0   : > { %v3729_v46 = vpop.eup %3728 }
0x13c1   : > { %v2542_v47 = vsel %vm2062_vm6, %v3729_v46, 0.0 }
0x13c2   : > { %2543 = vadd.xlane.f32.xlu0 %v2542_v47 }
0x13d8   : > { %2548 = vrot.lane.b32.xlu0 %v4334_v6, %s3846_s19 }
0x13de   : > { %v2479_v49 = vpop.f32.mrf.mxu1 }
0x13df   : > { %v2485_v51 = vadd.f32 %v2479_v49, %v2323_v48 }
0x13e0   : > { %v3549_v53 = vpop.f32.mrf.mxu1 }
0x13e2   : > { %v2482_v54 = vpop.f32.mrf.mxu1 }
0x13e4   : > { %v3550_v55 = vpop.f32.mrf.mxu1 }
0x144b   : > { %v2544_v56 = vpop.xlane.xlu0 %2543 }
0x144c   : > { %3730 = vrcp.f32 %v2544_v56 }
0x144f   : > { %v2549_v57 = vpop.permute.xlu0 %2548 }
0x1450   : > { %3558 = vmatpush3.bf16.msra.mxu1 %v2549_v57 }
0x1451   : > { %3569 = vmatprep.subr.bf16.mxu1 %v3834_v9 }
0x1459   : > { %v3731_v6 = vpop.eup %3730 }
0x145a   : > { %v2546_v58 = vmul.f32 %v3731_v6, %v3729_v46 }
0x145c   : > { %v2547_v59 = vpack.c.bf16 %v2546_v58, %v2546_v58 }
0x145e   : > { %3560 = vmatmul.mubr.msk.bf16.vlgmr.msra.gmra.mxu1 %vm2062_vm6, %v2547_v59 }
0x145f   : > { %3573 = vmatprep.mubr.msk.bf16.mxu1 %vm3835_vm2, %v3834_v9  ;;  %3570 = vmatpush3.bf16.msra.mxu1 %v3690_v18 }
0x1460   : > { %3571 = vmatprep.subr.bf16.mxu1 %v3834_v9 }
0x151e   : > { %v2588_v60 = vpop.f32.mrf.mxu1 }
0x151f   : > { %v2594_v61 = vpack.c.bf16 %v2588_v60, %v2588_v60 }
0x1520   : > { %v3561_v62 = vpop.f32.mrf.mxu1 }
0x1521   : > { %3566 = vmatmul.mubr.msk.bf16.vlgmr.msra.gmra.mxu0 %vm1206_vm3, %v2594_v61 }
0x1522   : > { %v2591_v63 = vpop.f32.mrf.mxu1  ;;  %3585 = vmatprep.mubr.msk.bf16.mxu0 %vm3835_vm2, %v3834_v9  ;;  %3578 = vmatpush3.bf16.msra.mxu0 %v3692_v28 }
0x1523   : > { %3579 = vmatprep.subr.bf16.mxu0 %v3834_v9 }
0x1524   : > { %v3562_v0 = vpop.f32.mrf.mxu1 }
0x1525   : > { %v3315_v0 = vld [vmem:[%s1086_s28] ss:$0 sm:$0xff] }
0x1526   : > { %3580 = vmatpush3.bf16.msra.mxu0 %v3693_v29 }
0x1527   : > { %3581 = vmatprep.subr.bf16.mxu0 %v3834_v9 }
0x152a   : > { %3582 = vmatpush3.bf16.msra.mxu0 %v3694_v30 }
0x152b   : > { %3583 = vmatprep.subr.bf16.mxu0 %v3834_v9 }
0x152e   : > { %3584 = vmatpush3.bf16.msra.mxu0 %v3695_v31 }
0x15e1   : > { %v2637_v2 = vpop.f32.mrf.mxu0 }
0x15e2   : > { %v2643_v3 = vadd.f32 %v2637_v2, %v2485_v51 }
0x15e3   : > { %v3567_v5 = vpop.f32.mrf.mxu0 }
0x15e4   : > { %v2644_v7 = vadd.f32 %v2643_v3, %v4297_v38  ;;  %v3691_v38 = vld [vmem:[%s4137_s29] sm:$0xff]   ;;  %s4661_s29 = scalar_lea.vmem %s4559_s17, %s4054_s5 }
0x15e5   : > { %v2640_v8 = vpop.f32.mrf.mxu0  ;;  %3572 = vmatpush3.bf16.msra.mxu1 %v3691_v38  ;;  %v3305_v24 = vld [vmem:[%s4661_s29] ss:$0 sm:$0xff] }
0x15e6   : > { %v4442_v10 = vadd.f32 %v3303_v4, %v2644_v7 }
0x15e7   : > { %v3568_v11 = vpop.f32.mrf.mxu0 }
0x15e8   : > { %v2655_v12 = vsel %vm1106_vm1, %v4442_v10, 0.0 }
0x15e9   : > { %2656 = vadd.xlane.f32.xlu1 %v2655_v12 }
0x1672   : > { %v2657_v13 = vpop.xlane.xlu1 %2656 }
0x1673   : > { %v2658_v37 = vmul.f32 0.03125, %v2657_v13 }
0x1675   : > { %v2659_v15 = vsub.f32 %v4442_v10, %v2658_v37 }
0x1677   : > { %v2660_v16 = vmul.f32 %v2659_v15, %v2659_v15 }
0x1679   : > { %v2661_v17 = vsel %vm1106_vm1, %v2660_v16, 0.0 }
0x167a   : > { %2662 = vadd.xlane.f32.xlu1 %v2661_v17 }
0x1703   : > { %v2663_v19 = vpop.xlane.xlu1 %2662 }
0x1704   : > { %v2664_v20 = vmul.f32 0.03125, %v2663_v19 }
0x1706   : > { %v2665_v21 = vadd.f32 1e-05, %v2664_v20 }
0x1708   : > { %3732 = vrsqrt.f32 %v2665_v21 }
0x1715   : > { %v3733_v22 = vpop.eup %3732 }
0x1716   : > { %v2667_v23 = vmul.f32 %v3733_v22, %v2659_v15 }
0x1718   : > { %v2674_v14 = vmul.f32 %v3304_v25, %v2667_v23 }
0x171a   : > { %v2681_v26 = vadd.f32 %v3305_v24, %v2674_v14 }
0x171c   : > { %v2686_v27 = vpack.c.bf16 %v2681_v26, %v2681_v26 }
0x171e   : > { %3574 = vmatmul.mubr.msk.bf16.vlgmr.msra.gmra.mxu1 %vm1106_vm1, %v2686_v27 }
0x17de   : > { %v2743_v33 = vpop.f32.mrf.mxu1 }
0x17df   : > { %v2744_v34 = vadd.f32 %v3306_v32, %v2743_v33 }
0x17e0   : > { %v3575_v35 = vpop.f32.mrf.mxu1 }
0x17e1   : > { %v2750_v36 = vmul.f32 0.70710677, %v2744_v34  ;;  %v2749_v59 = vmul.f32 0.5, %v2744_v34 }
0x17e2   : > { %v2746_v39 = vpop.f32.mrf.mxu1 }
0x17e3   : > { %v2751_v40 = vand.u32 2147483647, %v2750_v36  ;;  %vm2771_vm7 = vcmp.ge.f32.partialorder %v2750_v36, 0.0 }
0x17e4   : > { %v3576_v41 = vpop.f32.mrf.mxu1 }
0x17e5   : > { %v2752_v42 = vmul.f32 0.3275911, %v2751_v40  ;;  %v2765_v44 = vsub.f32 0.0, %v2751_v40 }
0x17e7   : > { %v2753_v43 = vadd.f32 1.0, %v2752_v42  ;;  %v2766_v45 = vmul.f32 %v2765_v44, %v2751_v40 }
0x17e9   : > { %3734 = vrcp.f32 %v2753_v43  ;;  %v2767_v46 = vmul.f32 1.442695, %v2766_v45 }
0x17eb   : > { %3736 = vpow2.f32 %v2767_v46 }
0x17f6   : > { %v3735_v9 = vpop.eup %3734 }
0x17f7   : > { %v2756_v1 = vmul.f32 1.0614054, %v3735_v9 }
0x17f8   : > { %v3737_v55 = vpop.eup %3736 }
0x17f9   : > { %v2757_v47 = vadd.f32 -1.4531521, %v2756_v1 }
0x17fb   : > { %v2758_v48 = vmul.f32 %v3735_v9, %v2757_v47 }
0x17fd   : > { %v2759_v49 = vadd.f32 1.4214138, %v2758_v48 }
0x17ff   : > { %v2760_v50 = vmul.f32 %v3735_v9, %v2759_v49 }
0x1801   : > { %v2761_v51 = vadd.f32 -0.28449672, %v2760_v50 }
0x1803   : > { %v2762_v52 = vmul.f32 %v3735_v9, %v2761_v51 }
0x1805   : > { %v2763_v53 = vadd.f32 0.2548296, %v2762_v52 }
0x1807   : > { %v2764_v54 = vmul.f32 %v3735_v9, %v2763_v53 }
0x1809   : > { %v2769_v56 = vmul.f32 %v3737_v55, %v2764_v54 }
0x180b   : > { %v2770_v57 = vsub.f32 1.0, %v2769_v56 }
0x180d   : > { %v2772_v6 = vsub.f32 0.0, %v2770_v57 }
0x180f   : > { %v2773_v58 = vsel %vm2771_vm7, %v2770_v57, %v2772_v6 }
0x1810   : > { %v2774_v60 = vadd.f32 1.0, %v2773_v58 }
0x1812   : > { %v2775_v61 = vmul.f32 %v2774_v60, %v2749_v59 }
0x1814   : > { %v2784_v62 = vpack.c.bf16 %v2775_v61, %v2775_v61 }
0x1816   : > { %3586 = vmatmul.mubr.msk.bf16.vlgmr.msra.gmra.mxu0 %vm2809_vm8, %v2784_v62 }
0x18d6   : > { %v2847_v63 = vpop.f32.mrf.mxu0 }
0x18d7   : > { %v2853_v2 = vadd.f32 %v2847_v63, %v4442_v10 }
0x18d8   : > { %v3587_v3 = vpop.f32.mrf.mxu0  ;;  %2866 = sbr.rel (%p3316_p1) target bundleno = 6573 (0x19ad), region = 124 }
0x18d9   : > { %v2861_v4 = vadd.f32 %v3315_v0, %v2853_v2 }
0x18da   : > { %v2850_v5 = vpop.f32.mrf.mxu0 }
0x18db   : > { %2862 = vst.msk [vmem:[#allocation2] sm:$0xff] %vm1106_vm1, %v2861_v4 }
0x18dc   : > { %v3588_v7 = vpop.f32.mrf.mxu0 }
0x18dd   : > { %v3738_v8 = vld [vmem:[%s4665_s21 + $0x8] sm:$0xff]   ;;  %v3848_v11 = vmov 0.0   ;;  %v3739_v10 = vld [vmem:[%s4665_s21] sm:$0xff]   ;;  %vm3849_vm9 = vmmov 0   ;;  %v2871_v12 = vpack.c.bf16 %v2861_v4, %v2861_v4 }
0x18de   : > { %3589 = vmatprep.subr.bf16.mxu0 %v3848_v11  ;;  %3593 = vmatprep.mubr.msk.bf16.mxu0 %vm3849_vm9, %v3848_v11  ;;  %v3317_v13 = vld [vmem:[%s4666_s27] ss:$0 sm:$0xff] }
0x18df   : > { %3590 = vmatpush3.bf16.msra.mxu0 %v3738_v8 }
0x18e0   : > { %3591 = vmatprep.subr.bf16.mxu0 %v3848_v11 }
0x18e3   : > { %3592 = vmatpush3.bf16.msra.mxu0 %v3739_v10 }
0x18e6   : > { %3594 = vmatmul.mubr.msk.bf16.vlgmr.msra.gmra.mxu0 %vm1106_vm1, %v2871_v12 }
0x19a6   : > { %v2928_v37 = vpop.f32.mrf.mxu0 }
0x19a7   : > { %v2929_v15 = vadd.f32 %v3317_v13, %v2928_v37 }
0x19a8   : > { %v3595_v16 = vpop.f32.mrf.mxu0 }
0x19a9   : > { %2934 = vst [vmem:[%s1003_s20] sm:$0xff] %v2929_v15 }
0x19aa   : > { %v2931_v17 = vpop.f32.mrf.mxu0 }
0x19ac   : > { %v3596_v18 = vpop.f32.mrf.mxu0 }
0x19ad PF: > { %s4667_s8 = sld [smem:[#allocation10_spill]]  ;;  %s2949_s6 = sshll.u32 %s1003_s20, 4  ;;  %s2950_s6 = int_to_ptr.vmem [resolvable:$true] %s2949_s6 }
0x19ae   : > { %s4668_s24 = sld [smem:[#allocation7_spill]]  ;;  %s3740_s12 = scalar_lea.vmem %s2950_s6, 128 }
0x19af   : > { %s4670_s18 = sld [smem:[#allocation41_spill]]  ;;  %p3741_p2 = scmp.ne.s32.totalorder %s2950_s6, %s3740_s12 }
0x19b0   : > { %s3850_s26 = smov [#allocation3]  }
0x19b1   : > { %p3742_p4 = pnand %p3741_p2, %p4025_p3  ;;  %s3744_s15 = sshll.u32 %s3850_s26, 4  ;;  %s3745_s15 = int_to_ptr.vmem [resolvable:$false] %s3744_s15 }
0x19b2   : > { %s3746_s0 = scalar_lea.vmem %s3745_s15, 256  ;;  %p3747_p6 = scmp.lt.s32.totalorder %s2950_s6, %s3745_s15 }
0x19b3   : > { %s3322_s11 = sshll.u32 %s4667_s8, 7  ;;  %p3743_p5 = pneg %p3742_p4 }
0x19b4   : > { %s4671_s29 = sand.u32 1, %s4668_s24   ;;  %p3748_p7 = scmp.lt.s32.totalorder %s3746_s0, %s3740_s12 }
0x19b5   : > { %s2947_s25 = scalar_lea.hbm %s4670_s18, %s3322_s11  ;;  %s2936_s23 = scalar_lea.sflag [#allocation4], %s4671_s29 }
0x19b6   : > { %p3749_p8 = por %p3748_p7, %p3747_p6 }
0x19b8   : > { %p3750_p10 = pnand %p3749_p8, %p3743_p5 }
0x19ba   : > { %3753 = shalt.err (!%p3750_p10)
}
0x19bb   : > { %s3754_s30 = scalar_lea.hbm %s2947_s25, 128  ;;  %s3758_s7 = scalar_lea.hbm %s4670_s18, 256 }
0x19bc   : > { %p3755_p11 = scmp.ne.s32.totalorder %s2947_s25, %s3754_s30  ;;  %p3759_p0 = scmp.lt.s32.totalorder %s2947_s25, %s4670_s18 }
0x19bd   : > { %p3760_p1 = scmp.lt.s32.totalorder %s3758_s7, %s3754_s30 }
0x19be   : > { %p3756_p12 = pnand %p3755_p11, %p4025_p3 }
0x19bf   : > { %p3761_p2 = por %p3760_p1, %p3759_p0 }
0x19c0   : > { %p3757_p13 = pneg %p3756_p12 }
0x19c2   : > { %p3762_p4 = pnand %p3761_p2, %p3757_p13 }
0x19c4   : > { %3765 = shalt.err (!%p3762_p4)
}
0x19c5   : > { %3597 = dma.vmem_to_hbm [thread:$0]  (%p4025_p3), %s2950_s6, 128, %s2947_s25, %s2936_s23  }
0x19c6 PF: > { %s4672_s5 = sld [smem:[#allocation13_spill]] }
0x19c7   : > { %s4673_s28 = sld [smem:[#allocation6_spill]] }
0x19cc   : > { %p3603_p5 = scmp.ge.s32.totalorder %s4672_s5, 2 }
0x19cd   : > { %s2961_s4 = sand.u32 1, %s4673_s28  }
0x19ce   : > { %p3600_p6 = pnand %p3603_p5, %p4035_p9  ;;  %s2962_s27 = scalar_lea.sflag [#allocation4], %s2961_s4 }
0x19d0   : > { %p3601_p7 = pneg %p3600_p6 }
0x19d2   : > { %3799 = dma.done.wait (%p3601_p7), %s2962_s27, 128  }
0x19d3   : > { %3801 = vsyncadd (%p3601_p7), %s2962_s27, 4294967168  ;;  %s37_s0 = sadd.s32 1, %s4672_s5   ;;  %s4675_s5 = sld [smem:[#allocation7_spill]] }
0x19d4   : > { %p34_p8 = scmp.ge.s32.totalorder %s37_s0, 6   ;;  %s4676_s26 = sld [smem:[#allocation8_spill]] }
0x19d5   : > { %s4677_s27 = sld [smem:[#allocation18_spill]] }
0x19d6   : > { %s4678_s28 = sld [smem:[#allocation11_spill]]  ;;  %36 = sbr.rel (!%p34_p8) target bundleno = 27 (0x1b), region = 228 }
0x19d7   : > { %s4679_s6 = sld [smem:[#allocation12_spill]] }
0x19d8   : > { %s4680_s2 = sld [smem:[#allocation14_spill]] }
0x19d9   : > { %s4681_s29 = sld [smem:[#allocation16_spill]] }
0x19db   :  { %2967 = vsyncpa [#allocation4], 1 }
0x19dc   :  { %2969 = vsyncpa [#allocation4 + $0x1], 1 }

</bundles_post_ra>
